<compile_context>
chip_gen: v5e
topology: v5e:2x2
jax: 0.10.0
libtpu: 0.0.40
codegen_flags: <defaults>
</compile_context>

<pallas_src>
import functools

import jax
import jax.numpy as jnp
from jax.experimental import pallas as pl
from jax.experimental.pallas import tpu as pltpu

LANES = 128


def bnn_kernel(params_ref, x_ref, o_ref, *, h):
    """params_ref: flat f32[4h + h*h + 1] in SMEM laid out [w1, b1, w2, b2, w3, b3]
    (w2 row-major [in, out], matching DeterministicLayer weight[in, out]).
    x_ref / o_ref: (tile_rows, 128) f32 VMEM blocks, samples packed in lanes."""
    w1_off = 0
    b1_off = w1_off + h
    w2_off = b1_off + h
    b2_off = w2_off + h * h
    w3_off = b2_off + h
    b3_off = w3_off + h

    x = x_ref[...]  # (tile_rows, 128) f32

    # ---- layer 1: outer product, unrolled over the h hidden units (VPU + EUP)
    h1 = [
        jnp.tanh(x * params_ref[w1_off + k] + params_ref[b1_off + k])
        for k in range(h)
    ]

    # ---- layer 2: h x h dense as unrolled scalar-broadcast multiply-adds
    h2 = []
    for j in range(h):
        acc = h1[0] * params_ref[w2_off + j] + params_ref[b2_off + j]
        for k in range(1, h):
            acc = acc + h1[k] * params_ref[w2_off + k * h + j]
        h2.append(jnp.tanh(acc))

    # ---- layer 3: h-term reduction to the single output feature
    y = h2[0] * params_ref[w3_off] + params_ref[b3_off]
    for j in range(1, h):
        y = y + h2[j] * params_ref[w3_off + j]

    o_ref[...] = y.astype(o_ref.dtype)


def bnn_forward(x, w1, b1, w2, b2, w3, b3, *, tile_rows=512):
    """Pallas implementation of BNN_for_HMC.forward.

    x: any shape; flattened to (-1, 1) like the PyTorch module.
    Returns an array of shape (N, 1), N = x.size.
    """
    h = w1.shape[1]

    xf = jnp.ravel(x).astype(jnp.float32)  # x.view(-1, 1) order
    n = xf.shape[0]

    # Lane-dense layout: samples packed as (rows, 128).
    rows = -(-n // LANES)
    # clamp the row tile for small inputs (keep (8,128) divisibility)
    tile_rows = max(8, min(tile_rows, ((rows + 7) // 8) * 8))
    rows_pad = -(-rows // tile_rows) * tile_rows
    n_pad = rows_pad * LANES
    if n_pad != n:
        # only copies when N is not already aligned to the tile;
        # padded samples are sliced off at the end.
        xf = jnp.pad(xf, (0, n_pad - n))
    x2 = xf.reshape(rows_pad, LANES)

    # Flat parameter vector for SMEM: [w1, b1, w2(row-major in,out), b2, w3, b3].
    params = jnp.concatenate(
        [
            jnp.ravel(w1).astype(jnp.float32),
            jnp.ravel(b1).astype(jnp.float32),
            jnp.ravel(w2).astype(jnp.float32),
            jnp.ravel(b2).astype(jnp.float32),
            jnp.ravel(w3).astype(jnp.float32),
            jnp.ravel(b3).astype(jnp.float32),
        ]
    )

    grid = (rows_pad // tile_rows,)

    out = pl.pallas_call(
        functools.partial(bnn_kernel, h=h),
        out_shape=jax.ShapeDtypeStruct((rows_pad, LANES), jnp.float32),
        grid_spec=pltpu.PrefetchScalarGridSpec(
            num_scalar_prefetch=0,
            grid=grid,
            in_specs=[
                # all 141 weight/bias scalars, once, in SMEM
                pl.BlockSpec(memory_space=pltpu.MemorySpace.SMEM),
                # lane-dense sample tile
                pl.BlockSpec((tile_rows, LANES), lambda i: (i, 0)),
            ],
            out_specs=pl.BlockSpec((tile_rows, LANES), lambda i: (i, 0)),
        ),
        compiler_params=pltpu.CompilerParams(
            dimension_semantics=("parallel",),
        ),
    )(params, x2)

    # back to the PyTorch (N, 1) output layout
    return out.reshape(n_pad, 1)[:n]


def reference_forward(x, w1, b1, w2, b2, w3, b3):
    hp = jax.lax.Precision.HIGHEST
    xf = jnp.reshape(x, (-1, 1)).astype(jnp.float32)
    h1 = jnp.tanh(jnp.dot(xf, w1, precision=hp) + b1)
    h2 = jnp.tanh(jnp.dot(h1, w2, precision=hp) + b2)
    return jnp.dot(h2, w3, precision=hp) + b3


if __name__ == "__main__":
    input_size, num_nodes, output_size = 1, 10, 1

    key = jax.random.PRNGKey(0)
    kx, k1, kb1, k2, kb2, k3, kb3 = jax.random.split(key, 7)

    # DeterministicLayer convention: weight[in, out], bias[out]
    w1 = jax.random.normal(k1, (input_size, num_nodes), jnp.float32) * 0.5
    b1 = jax.random.normal(kb1, (num_nodes,), jnp.float32) * 0.1
    w2 = jax.random.normal(k2, (num_nodes, num_nodes), jnp.float32) * 0.5
    b2 = jax.random.normal(kb2, (num_nodes,), jnp.float32) * 0.1
    w3 = jax.random.normal(k3, (num_nodes, output_size), jnp.float32) * 0.5
    b3 = jax.random.normal(kb3, (output_size,), jnp.float32) * 0.1

    # small input; forward flattens to (-1, 1) -> (2048, 1)
    x = jax.random.normal(kx, (2, 4, 16, 16), jnp.float32)

    y = bnn_forward(x, w1, b1, w2, b2, w3, b3)
    y = jax.block_until_ready(y)

    y_ref = reference_forward(x, w1, b1, w2, b2, w3, b3)
    assert y.shape == (x.size, 1)
    assert jnp.allclose(y, y_ref, atol=1e-4, rtol=1e-4)

    print("KERNEL_OK")
</pallas_src>

<mosaic_0001>
module attributes {stable_mosaic.version = 11 : i64} {
  func.func @bnn_kernel(%arg0: i32, %arg1: memref<141xf32, #tpu.memory_space<smem>>, %arg2: memref<16x128xf32, #tpu.memory_space<vmem>>, %arg3: memref<16x128xf32, #tpu.memory_space<vmem>>) attributes {dimension_semantics = [#tpu.dimension_semantics<parallel>], iteration_bounds = array<i64: 1>, scalar_prefetch = 0 : i64, scratch_operands = 0 : i64, tpu.core_type = #tpu.core_type<tc>, window_params = [{transform_indices = @transform_0, window_bounds = array<i64: 141>}, {transform_indices = @transform_1, window_bounds = array<i64: 16, 128>}, {transform_indices = @transform_2, window_bounds = array<i64: 16, 128>}]} {
    %c0 = arith.constant 0 : index
    %c0_0 = arith.constant 0 : index
    %0 = vector.load %arg2[%c0, %c0_0] : memref<16x128xf32, #tpu.memory_space<vmem>>, vector<16x128xf32>
    %c0_1 = arith.constant 0 : index
    %1 = memref.load %arg1[%c0_1] : memref<141xf32, #tpu.memory_space<smem>>
    %2 = vector.broadcast %1 : f32 to vector<16x128xf32>
    %3 = arith.mulf %0, %2 : vector<16x128xf32>
    %c10 = arith.constant 10 : index
    %4 = memref.load %arg1[%c10] : memref<141xf32, #tpu.memory_space<smem>>
    %5 = vector.broadcast %4 : f32 to vector<16x128xf32>
    %6 = arith.addf %3, %5 : vector<16x128xf32>
    %7 = math.tanh %6 : vector<16x128xf32>
    %c1 = arith.constant 1 : index
    %8 = memref.load %arg1[%c1] : memref<141xf32, #tpu.memory_space<smem>>
    %9 = vector.broadcast %8 : f32 to vector<16x128xf32>
    %10 = arith.mulf %0, %9 : vector<16x128xf32>
    %c11 = arith.constant 11 : index
    %11 = memref.load %arg1[%c11] : memref<141xf32, #tpu.memory_space<smem>>
    %12 = vector.broadcast %11 : f32 to vector<16x128xf32>
    %13 = arith.addf %10, %12 : vector<16x128xf32>
    %14 = math.tanh %13 : vector<16x128xf32>
    %c2 = arith.constant 2 : index
    %15 = memref.load %arg1[%c2] : memref<141xf32, #tpu.memory_space<smem>>
    %16 = vector.broadcast %15 : f32 to vector<16x128xf32>
    %17 = arith.mulf %0, %16 : vector<16x128xf32>
    %c12 = arith.constant 12 : index
    %18 = memref.load %arg1[%c12] : memref<141xf32, #tpu.memory_space<smem>>
    %19 = vector.broadcast %18 : f32 to vector<16x128xf32>
    %20 = arith.addf %17, %19 : vector<16x128xf32>
    %21 = math.tanh %20 : vector<16x128xf32>
    %c3 = arith.constant 3 : index
    %22 = memref.load %arg1[%c3] : memref<141xf32, #tpu.memory_space<smem>>
    %23 = vector.broadcast %22 : f32 to vector<16x128xf32>
    %24 = arith.mulf %0, %23 : vector<16x128xf32>
    %c13 = arith.constant 13 : index
    %25 = memref.load %arg1[%c13] : memref<141xf32, #tpu.memory_space<smem>>
    %26 = vector.broadcast %25 : f32 to vector<16x128xf32>
    %27 = arith.addf %24, %26 : vector<16x128xf32>
    %28 = math.tanh %27 : vector<16x128xf32>
    %c4 = arith.constant 4 : index
    %29 = memref.load %arg1[%c4] : memref<141xf32, #tpu.memory_space<smem>>
    %30 = vector.broadcast %29 : f32 to vector<16x128xf32>
    %31 = arith.mulf %0, %30 : vector<16x128xf32>
    %c14 = arith.constant 14 : index
    %32 = memref.load %arg1[%c14] : memref<141xf32, #tpu.memory_space<smem>>
    %33 = vector.broadcast %32 : f32 to vector<16x128xf32>
    %34 = arith.addf %31, %33 : vector<16x128xf32>
    %35 = math.tanh %34 : vector<16x128xf32>
    %c5 = arith.constant 5 : index
    %36 = memref.load %arg1[%c5] : memref<141xf32, #tpu.memory_space<smem>>
    %37 = vector.broadcast %36 : f32 to vector<16x128xf32>
    %38 = arith.mulf %0, %37 : vector<16x128xf32>
    %c15 = arith.constant 15 : index
    %39 = memref.load %arg1[%c15] : memref<141xf32, #tpu.memory_space<smem>>
    %40 = vector.broadcast %39 : f32 to vector<16x128xf32>
    %41 = arith.addf %38, %40 : vector<16x128xf32>
    %42 = math.tanh %41 : vector<16x128xf32>
    %c6 = arith.constant 6 : index
    %43 = memref.load %arg1[%c6] : memref<141xf32, #tpu.memory_space<smem>>
    %44 = vector.broadcast %43 : f32 to vector<16x128xf32>
    %45 = arith.mulf %0, %44 : vector<16x128xf32>
    %c16 = arith.constant 16 : index
    %46 = memref.load %arg1[%c16] : memref<141xf32, #tpu.memory_space<smem>>
    %47 = vector.broadcast %46 : f32 to vector<16x128xf32>
    %48 = arith.addf %45, %47 : vector<16x128xf32>
    %49 = math.tanh %48 : vector<16x128xf32>
    %c7 = arith.constant 7 : index
    %50 = memref.load %arg1[%c7] : memref<141xf32, #tpu.memory_space<smem>>
    %51 = vector.broadcast %50 : f32 to vector<16x128xf32>
    %52 = arith.mulf %0, %51 : vector<16x128xf32>
    %c17 = arith.constant 17 : index
    %53 = memref.load %arg1[%c17] : memref<141xf32, #tpu.memory_space<smem>>
    %54 = vector.broadcast %53 : f32 to vector<16x128xf32>
    %55 = arith.addf %52, %54 : vector<16x128xf32>
    %56 = math.tanh %55 : vector<16x128xf32>
    %c8 = arith.constant 8 : index
    %57 = memref.load %arg1[%c8] : memref<141xf32, #tpu.memory_space<smem>>
    %58 = vector.broadcast %57 : f32 to vector<16x128xf32>
    %59 = arith.mulf %0, %58 : vector<16x128xf32>
    %c18 = arith.constant 18 : index
    %60 = memref.load %arg1[%c18] : memref<141xf32, #tpu.memory_space<smem>>
    %61 = vector.broadcast %60 : f32 to vector<16x128xf32>
    %62 = arith.addf %59, %61 : vector<16x128xf32>
    %63 = math.tanh %62 : vector<16x128xf32>
    %c9 = arith.constant 9 : index
    %64 = memref.load %arg1[%c9] : memref<141xf32, #tpu.memory_space<smem>>
    %65 = vector.broadcast %64 : f32 to vector<16x128xf32>
    %66 = arith.mulf %0, %65 : vector<16x128xf32>
    %c19 = arith.constant 19 : index
    %67 = memref.load %arg1[%c19] : memref<141xf32, #tpu.memory_space<smem>>
    %68 = vector.broadcast %67 : f32 to vector<16x128xf32>
    %69 = arith.addf %66, %68 : vector<16x128xf32>
    %70 = math.tanh %69 : vector<16x128xf32>
    %c20 = arith.constant 20 : index
    %71 = memref.load %arg1[%c20] : memref<141xf32, #tpu.memory_space<smem>>
    %72 = vector.broadcast %71 : f32 to vector<16x128xf32>
    %73 = arith.mulf %7, %72 : vector<16x128xf32>
    %c120 = arith.constant 120 : index
    %74 = memref.load %arg1[%c120] : memref<141xf32, #tpu.memory_space<smem>>
    %75 = vector.broadcast %74 : f32 to vector<16x128xf32>
    %76 = arith.addf %73, %75 : vector<16x128xf32>
    %c30 = arith.constant 30 : index
    %77 = memref.load %arg1[%c30] : memref<141xf32, #tpu.memory_space<smem>>
    %78 = vector.broadcast %77 : f32 to vector<16x128xf32>
    %79 = arith.mulf %14, %78 : vector<16x128xf32>
    %80 = arith.addf %76, %79 : vector<16x128xf32>
    %c40 = arith.constant 40 : index
    %81 = memref.load %arg1[%c40] : memref<141xf32, #tpu.memory_space<smem>>
    %82 = vector.broadcast %81 : f32 to vector<16x128xf32>
    %83 = arith.mulf %21, %82 : vector<16x128xf32>
    %84 = arith.addf %80, %83 : vector<16x128xf32>
    %c50 = arith.constant 50 : index
    %85 = memref.load %arg1[%c50] : memref<141xf32, #tpu.memory_space<smem>>
    %86 = vector.broadcast %85 : f32 to vector<16x128xf32>
    %87 = arith.mulf %28, %86 : vector<16x128xf32>
    %88 = arith.addf %84, %87 : vector<16x128xf32>
    %c60 = arith.constant 60 : index
    %89 = memref.load %arg1[%c60] : memref<141xf32, #tpu.memory_space<smem>>
    %90 = vector.broadcast %89 : f32 to vector<16x128xf32>
    %91 = arith.mulf %35, %90 : vector<16x128xf32>
    %92 = arith.addf %88, %91 : vector<16x128xf32>
    %c70 = arith.constant 70 : index
    %93 = memref.load %arg1[%c70] : memref<141xf32, #tpu.memory_space<smem>>
    %94 = vector.broadcast %93 : f32 to vector<16x128xf32>
    %95 = arith.mulf %42, %94 : vector<16x128xf32>
    %96 = arith.addf %92, %95 : vector<16x128xf32>
    %c80 = arith.constant 80 : index
    %97 = memref.load %arg1[%c80] : memref<141xf32, #tpu.memory_space<smem>>
    %98 = vector.broadcast %97 : f32 to vector<16x128xf32>
    %99 = arith.mulf %49, %98 : vector<16x128xf32>
    %100 = arith.addf %96, %99 : vector<16x128xf32>
    %c90 = arith.constant 90 : index
    %101 = memref.load %arg1[%c90] : memref<141xf32, #tpu.memory_space<smem>>
    %102 = vector.broadcast %101 : f32 to vector<16x128xf32>
    %103 = arith.mulf %56, %102 : vector<16x128xf32>
    %104 = arith.addf %100, %103 : vector<16x128xf32>
    %c100 = arith.constant 100 : index
    %105 = memref.load %arg1[%c100] : memref<141xf32, #tpu.memory_space<smem>>
    %106 = vector.broadcast %105 : f32 to vector<16x128xf32>
    %107 = arith.mulf %63, %106 : vector<16x128xf32>
    %108 = arith.addf %104, %107 : vector<16x128xf32>
    %c110 = arith.constant 110 : index
    %109 = memref.load %arg1[%c110] : memref<141xf32, #tpu.memory_space<smem>>
    %110 = vector.broadcast %109 : f32 to vector<16x128xf32>
    %111 = arith.mulf %70, %110 : vector<16x128xf32>
    %112 = arith.addf %108, %111 : vector<16x128xf32>
    %113 = math.tanh %112 : vector<16x128xf32>
    %c21 = arith.constant 21 : index
    %114 = memref.load %arg1[%c21] : memref<141xf32, #tpu.memory_space<smem>>
    %115 = vector.broadcast %114 : f32 to vector<16x128xf32>
    %116 = arith.mulf %7, %115 : vector<16x128xf32>
    %c121 = arith.constant 121 : index
    %117 = memref.load %arg1[%c121] : memref<141xf32, #tpu.memory_space<smem>>
    %118 = vector.broadcast %117 : f32 to vector<16x128xf32>
    %119 = arith.addf %116, %118 : vector<16x128xf32>
    %c31 = arith.constant 31 : index
    %120 = memref.load %arg1[%c31] : memref<141xf32, #tpu.memory_space<smem>>
    %121 = vector.broadcast %120 : f32 to vector<16x128xf32>
    %122 = arith.mulf %14, %121 : vector<16x128xf32>
    %123 = arith.addf %119, %122 : vector<16x128xf32>
    %c41 = arith.constant 41 : index
    %124 = memref.load %arg1[%c41] : memref<141xf32, #tpu.memory_space<smem>>
    %125 = vector.broadcast %124 : f32 to vector<16x128xf32>
    %126 = arith.mulf %21, %125 : vector<16x128xf32>
    %127 = arith.addf %123, %126 : vector<16x128xf32>
    %c51 = arith.constant 51 : index
    %128 = memref.load %arg1[%c51] : memref<141xf32, #tpu.memory_space<smem>>
    %129 = vector.broadcast %128 : f32 to vector<16x128xf32>
    %130 = arith.mulf %28, %129 : vector<16x128xf32>
    %131 = arith.addf %127, %130 : vector<16x128xf32>
    %c61 = arith.constant 61 : index
    %132 = memref.load %arg1[%c61] : memref<141xf32, #tpu.memory_space<smem>>
    %133 = vector.broadcast %132 : f32 to vector<16x128xf32>
    %134 = arith.mulf %35, %133 : vector<16x128xf32>
    %135 = arith.addf %131, %134 : vector<16x128xf32>
    %c71 = arith.constant 71 : index
    %136 = memref.load %arg1[%c71] : memref<141xf32, #tpu.memory_space<smem>>
    %137 = vector.broadcast %136 : f32 to vector<16x128xf32>
    %138 = arith.mulf %42, %137 : vector<16x128xf32>
    %139 = arith.addf %135, %138 : vector<16x128xf32>
    %c81 = arith.constant 81 : index
    %140 = memref.load %arg1[%c81] : memref<141xf32, #tpu.memory_space<smem>>
    %141 = vector.broadcast %140 : f32 to vector<16x128xf32>
    %142 = arith.mulf %49, %141 : vector<16x128xf32>
    %143 = arith.addf %139, %142 : vector<16x128xf32>
    %c91 = arith.constant 91 : index
    %144 = memref.load %arg1[%c91] : memref<141xf32, #tpu.memory_space<smem>>
    %145 = vector.broadcast %144 : f32 to vector<16x128xf32>
    %146 = arith.mulf %56, %145 : vector<16x128xf32>
    %147 = arith.addf %143, %146 : vector<16x128xf32>
    %c101 = arith.constant 101 : index
    %148 = memref.load %arg1[%c101] : memref<141xf32, #tpu.memory_space<smem>>
    %149 = vector.broadcast %148 : f32 to vector<16x128xf32>
    %150 = arith.mulf %63, %149 : vector<16x128xf32>
    %151 = arith.addf %147, %150 : vector<16x128xf32>
    %c111 = arith.constant 111 : index
    %152 = memref.load %arg1[%c111] : memref<141xf32, #tpu.memory_space<smem>>
    %153 = vector.broadcast %152 : f32 to vector<16x128xf32>
    %154 = arith.mulf %70, %153 : vector<16x128xf32>
    %155 = arith.addf %151, %154 : vector<16x128xf32>
    %156 = math.tanh %155 : vector<16x128xf32>
    %c22 = arith.constant 22 : index
    %157 = memref.load %arg1[%c22] : memref<141xf32, #tpu.memory_space<smem>>
    %158 = vector.broadcast %157 : f32 to vector<16x128xf32>
    %159 = arith.mulf %7, %158 : vector<16x128xf32>
    %c122 = arith.constant 122 : index
    %160 = memref.load %arg1[%c122] : memref<141xf32, #tpu.memory_space<smem>>
    %161 = vector.broadcast %160 : f32 to vector<16x128xf32>
    %162 = arith.addf %159, %161 : vector<16x128xf32>
    %c32 = arith.constant 32 : index
    %163 = memref.load %arg1[%c32] : memref<141xf32, #tpu.memory_space<smem>>
    %164 = vector.broadcast %163 : f32 to vector<16x128xf32>
    %165 = arith.mulf %14, %164 : vector<16x128xf32>
    %166 = arith.addf %162, %165 : vector<16x128xf32>
    %c42 = arith.constant 42 : index
    %167 = memref.load %arg1[%c42] : memref<141xf32, #tpu.memory_space<smem>>
    %168 = vector.broadcast %167 : f32 to vector<16x128xf32>
    %169 = arith.mulf %21, %168 : vector<16x128xf32>
    %170 = arith.addf %166, %169 : vector<16x128xf32>
    %c52 = arith.constant 52 : index
    %171 = memref.load %arg1[%c52] : memref<141xf32, #tpu.memory_space<smem>>
    %172 = vector.broadcast %171 : f32 to vector<16x128xf32>
    %173 = arith.mulf %28, %172 : vector<16x128xf32>
    %174 = arith.addf %170, %173 : vector<16x128xf32>
    %c62 = arith.constant 62 : index
    %175 = memref.load %arg1[%c62] : memref<141xf32, #tpu.memory_space<smem>>
    %176 = vector.broadcast %175 : f32 to vector<16x128xf32>
    %177 = arith.mulf %35, %176 : vector<16x128xf32>
    %178 = arith.addf %174, %177 : vector<16x128xf32>
    %c72 = arith.constant 72 : index
    %179 = memref.load %arg1[%c72] : memref<141xf32, #tpu.memory_space<smem>>
    %180 = vector.broadcast %179 : f32 to vector<16x128xf32>
    %181 = arith.mulf %42, %180 : vector<16x128xf32>
    %182 = arith.addf %178, %181 : vector<16x128xf32>
    %c82 = arith.constant 82 : index
    %183 = memref.load %arg1[%c82] : memref<141xf32, #tpu.memory_space<smem>>
    %184 = vector.broadcast %183 : f32 to vector<16x128xf32>
    %185 = arith.mulf %49, %184 : vector<16x128xf32>
    %186 = arith.addf %182, %185 : vector<16x128xf32>
    %c92 = arith.constant 92 : index
    %187 = memref.load %arg1[%c92] : memref<141xf32, #tpu.memory_space<smem>>
    %188 = vector.broadcast %187 : f32 to vector<16x128xf32>
    %189 = arith.mulf %56, %188 : vector<16x128xf32>
    %190 = arith.addf %186, %189 : vector<16x128xf32>
    %c102 = arith.constant 102 : index
    %191 = memref.load %arg1[%c102] : memref<141xf32, #tpu.memory_space<smem>>
    %192 = vector.broadcast %191 : f32 to vector<16x128xf32>
    %193 = arith.mulf %63, %192 : vector<16x128xf32>
    %194 = arith.addf %190, %193 : vector<16x128xf32>
    %c112 = arith.constant 112 : index
    %195 = memref.load %arg1[%c112] : memref<141xf32, #tpu.memory_space<smem>>
    %196 = vector.broadcast %195 : f32 to vector<16x128xf32>
    %197 = arith.mulf %70, %196 : vector<16x128xf32>
    %198 = arith.addf %194, %197 : vector<16x128xf32>
    %199 = math.tanh %198 : vector<16x128xf32>
    %c23 = arith.constant 23 : index
    %200 = memref.load %arg1[%c23] : memref<141xf32, #tpu.memory_space<smem>>
    %201 = vector.broadcast %200 : f32 to vector<16x128xf32>
    %202 = arith.mulf %7, %201 : vector<16x128xf32>
    %c123 = arith.constant 123 : index
    %203 = memref.load %arg1[%c123] : memref<141xf32, #tpu.memory_space<smem>>
    %204 = vector.broadcast %203 : f32 to vector<16x128xf32>
    %205 = arith.addf %202, %204 : vector<16x128xf32>
    %c33 = arith.constant 33 : index
    %206 = memref.load %arg1[%c33] : memref<141xf32, #tpu.memory_space<smem>>
    %207 = vector.broadcast %206 : f32 to vector<16x128xf32>
    %208 = arith.mulf %14, %207 : vector<16x128xf32>
    %209 = arith.addf %205, %208 : vector<16x128xf32>
    %c43 = arith.constant 43 : index
    %210 = memref.load %arg1[%c43] : memref<141xf32, #tpu.memory_space<smem>>
    %211 = vector.broadcast %210 : f32 to vector<16x128xf32>
    %212 = arith.mulf %21, %211 : vector<16x128xf32>
    %213 = arith.addf %209, %212 : vector<16x128xf32>
    %c53 = arith.constant 53 : index
    %214 = memref.load %arg1[%c53] : memref<141xf32, #tpu.memory_space<smem>>
    %215 = vector.broadcast %214 : f32 to vector<16x128xf32>
    %216 = arith.mulf %28, %215 : vector<16x128xf32>
    %217 = arith.addf %213, %216 : vector<16x128xf32>
    %c63 = arith.constant 63 : index
    %218 = memref.load %arg1[%c63] : memref<141xf32, #tpu.memory_space<smem>>
    %219 = vector.broadcast %218 : f32 to vector<16x128xf32>
    %220 = arith.mulf %35, %219 : vector<16x128xf32>
    %221 = arith.addf %217, %220 : vector<16x128xf32>
    %c73 = arith.constant 73 : index
    %222 = memref.load %arg1[%c73] : memref<141xf32, #tpu.memory_space<smem>>
    %223 = vector.broadcast %222 : f32 to vector<16x128xf32>
    %224 = arith.mulf %42, %223 : vector<16x128xf32>
    %225 = arith.addf %221, %224 : vector<16x128xf32>
    %c83 = arith.constant 83 : index
    %226 = memref.load %arg1[%c83] : memref<141xf32, #tpu.memory_space<smem>>
    %227 = vector.broadcast %226 : f32 to vector<16x128xf32>
    %228 = arith.mulf %49, %227 : vector<16x128xf32>
    %229 = arith.addf %225, %228 : vector<16x128xf32>
    %c93 = arith.constant 93 : index
    %230 = memref.load %arg1[%c93] : memref<141xf32, #tpu.memory_space<smem>>
    %231 = vector.broadcast %230 : f32 to vector<16x128xf32>
    %232 = arith.mulf %56, %231 : vector<16x128xf32>
    %233 = arith.addf %229, %232 : vector<16x128xf32>
    %c103 = arith.constant 103 : index
    %234 = memref.load %arg1[%c103] : memref<141xf32, #tpu.memory_space<smem>>
    %235 = vector.broadcast %234 : f32 to vector<16x128xf32>
    %236 = arith.mulf %63, %235 : vector<16x128xf32>
    %237 = arith.addf %233, %236 : vector<16x128xf32>
    %c113 = arith.constant 113 : index
    %238 = memref.load %arg1[%c113] : memref<141xf32, #tpu.memory_space<smem>>
    %239 = vector.broadcast %238 : f32 to vector<16x128xf32>
    %240 = arith.mulf %70, %239 : vector<16x128xf32>
    %241 = arith.addf %237, %240 : vector<16x128xf32>
    %242 = math.tanh %241 : vector<16x128xf32>
    %c24 = arith.constant 24 : index
    %243 = memref.load %arg1[%c24] : memref<141xf32, #tpu.memory_space<smem>>
    %244 = vector.broadcast %243 : f32 to vector<16x128xf32>
    %245 = arith.mulf %7, %244 : vector<16x128xf32>
    %c124 = arith.constant 124 : index
    %246 = memref.load %arg1[%c124] : memref<141xf32, #tpu.memory_space<smem>>
    %247 = vector.broadcast %246 : f32 to vector<16x128xf32>
    %248 = arith.addf %245, %247 : vector<16x128xf32>
    %c34 = arith.constant 34 : index
    %249 = memref.load %arg1[%c34] : memref<141xf32, #tpu.memory_space<smem>>
    %250 = vector.broadcast %249 : f32 to vector<16x128xf32>
    %251 = arith.mulf %14, %250 : vector<16x128xf32>
    %252 = arith.addf %248, %251 : vector<16x128xf32>
    %c44 = arith.constant 44 : index
    %253 = memref.load %arg1[%c44] : memref<141xf32, #tpu.memory_space<smem>>
    %254 = vector.broadcast %253 : f32 to vector<16x128xf32>
    %255 = arith.mulf %21, %254 : vector<16x128xf32>
    %256 = arith.addf %252, %255 : vector<16x128xf32>
    %c54 = arith.constant 54 : index
    %257 = memref.load %arg1[%c54] : memref<141xf32, #tpu.memory_space<smem>>
    %258 = vector.broadcast %257 : f32 to vector<16x128xf32>
    %259 = arith.mulf %28, %258 : vector<16x128xf32>
    %260 = arith.addf %256, %259 : vector<16x128xf32>
    %c64 = arith.constant 64 : index
    %261 = memref.load %arg1[%c64] : memref<141xf32, #tpu.memory_space<smem>>
    %262 = vector.broadcast %261 : f32 to vector<16x128xf32>
    %263 = arith.mulf %35, %262 : vector<16x128xf32>
    %264 = arith.addf %260, %263 : vector<16x128xf32>
    %c74 = arith.constant 74 : index
    %265 = memref.load %arg1[%c74] : memref<141xf32, #tpu.memory_space<smem>>
    %266 = vector.broadcast %265 : f32 to vector<16x128xf32>
    %267 = arith.mulf %42, %266 : vector<16x128xf32>
    %268 = arith.addf %264, %267 : vector<16x128xf32>
    %c84 = arith.constant 84 : index
    %269 = memref.load %arg1[%c84] : memref<141xf32, #tpu.memory_space<smem>>
    %270 = vector.broadcast %269 : f32 to vector<16x128xf32>
    %271 = arith.mulf %49, %270 : vector<16x128xf32>
    %272 = arith.addf %268, %271 : vector<16x128xf32>
    %c94 = arith.constant 94 : index
    %273 = memref.load %arg1[%c94] : memref<141xf32, #tpu.memory_space<smem>>
    %274 = vector.broadcast %273 : f32 to vector<16x128xf32>
    %275 = arith.mulf %56, %274 : vector<16x128xf32>
    %276 = arith.addf %272, %275 : vector<16x128xf32>
    %c104 = arith.constant 104 : index
    %277 = memref.load %arg1[%c104] : memref<141xf32, #tpu.memory_space<smem>>
    %278 = vector.broadcast %277 : f32 to vector<16x128xf32>
    %279 = arith.mulf %63, %278 : vector<16x128xf32>
    %280 = arith.addf %276, %279 : vector<16x128xf32>
    %c114 = arith.constant 114 : index
    %281 = memref.load %arg1[%c114] : memref<141xf32, #tpu.memory_space<smem>>
    %282 = vector.broadcast %281 : f32 to vector<16x128xf32>
    %283 = arith.mulf %70, %282 : vector<16x128xf32>
    %284 = arith.addf %280, %283 : vector<16x128xf32>
    %285 = math.tanh %284 : vector<16x128xf32>
    %c25 = arith.constant 25 : index
    %286 = memref.load %arg1[%c25] : memref<141xf32, #tpu.memory_space<smem>>
    %287 = vector.broadcast %286 : f32 to vector<16x128xf32>
    %288 = arith.mulf %7, %287 : vector<16x128xf32>
    %c125 = arith.constant 125 : index
    %289 = memref.load %arg1[%c125] : memref<141xf32, #tpu.memory_space<smem>>
    %290 = vector.broadcast %289 : f32 to vector<16x128xf32>
    %291 = arith.addf %288, %290 : vector<16x128xf32>
    %c35 = arith.constant 35 : index
    %292 = memref.load %arg1[%c35] : memref<141xf32, #tpu.memory_space<smem>>
    %293 = vector.broadcast %292 : f32 to vector<16x128xf32>
    %294 = arith.mulf %14, %293 : vector<16x128xf32>
    %295 = arith.addf %291, %294 : vector<16x128xf32>
    %c45 = arith.constant 45 : index
    %296 = memref.load %arg1[%c45] : memref<141xf32, #tpu.memory_space<smem>>
    %297 = vector.broadcast %296 : f32 to vector<16x128xf32>
    %298 = arith.mulf %21, %297 : vector<16x128xf32>
    %299 = arith.addf %295, %298 : vector<16x128xf32>
    %c55 = arith.constant 55 : index
    %300 = memref.load %arg1[%c55] : memref<141xf32, #tpu.memory_space<smem>>
    %301 = vector.broadcast %300 : f32 to vector<16x128xf32>
    %302 = arith.mulf %28, %301 : vector<16x128xf32>
    %303 = arith.addf %299, %302 : vector<16x128xf32>
    %c65 = arith.constant 65 : index
    %304 = memref.load %arg1[%c65] : memref<141xf32, #tpu.memory_space<smem>>
    %305 = vector.broadcast %304 : f32 to vector<16x128xf32>
    %306 = arith.mulf %35, %305 : vector<16x128xf32>
    %307 = arith.addf %303, %306 : vector<16x128xf32>
    %c75 = arith.constant 75 : index
    %308 = memref.load %arg1[%c75] : memref<141xf32, #tpu.memory_space<smem>>
    %309 = vector.broadcast %308 : f32 to vector<16x128xf32>
    %310 = arith.mulf %42, %309 : vector<16x128xf32>
    %311 = arith.addf %307, %310 : vector<16x128xf32>
    %c85 = arith.constant 85 : index
    %312 = memref.load %arg1[%c85] : memref<141xf32, #tpu.memory_space<smem>>
    %313 = vector.broadcast %312 : f32 to vector<16x128xf32>
    %314 = arith.mulf %49, %313 : vector<16x128xf32>
    %315 = arith.addf %311, %314 : vector<16x128xf32>
    %c95 = arith.constant 95 : index
    %316 = memref.load %arg1[%c95] : memref<141xf32, #tpu.memory_space<smem>>
    %317 = vector.broadcast %316 : f32 to vector<16x128xf32>
    %318 = arith.mulf %56, %317 : vector<16x128xf32>
    %319 = arith.addf %315, %318 : vector<16x128xf32>
    %c105 = arith.constant 105 : index
    %320 = memref.load %arg1[%c105] : memref<141xf32, #tpu.memory_space<smem>>
    %321 = vector.broadcast %320 : f32 to vector<16x128xf32>
    %322 = arith.mulf %63, %321 : vector<16x128xf32>
    %323 = arith.addf %319, %322 : vector<16x128xf32>
    %c115 = arith.constant 115 : index
    %324 = memref.load %arg1[%c115] : memref<141xf32, #tpu.memory_space<smem>>
    %325 = vector.broadcast %324 : f32 to vector<16x128xf32>
    %326 = arith.mulf %70, %325 : vector<16x128xf32>
    %327 = arith.addf %323, %326 : vector<16x128xf32>
    %328 = math.tanh %327 : vector<16x128xf32>
    %c26 = arith.constant 26 : index
    %329 = memref.load %arg1[%c26] : memref<141xf32, #tpu.memory_space<smem>>
    %330 = vector.broadcast %329 : f32 to vector<16x128xf32>
    %331 = arith.mulf %7, %330 : vector<16x128xf32>
    %c126 = arith.constant 126 : index
    %332 = memref.load %arg1[%c126] : memref<141xf32, #tpu.memory_space<smem>>
    %333 = vector.broadcast %332 : f32 to vector<16x128xf32>
    %334 = arith.addf %331, %333 : vector<16x128xf32>
    %c36 = arith.constant 36 : index
    %335 = memref.load %arg1[%c36] : memref<141xf32, #tpu.memory_space<smem>>
    %336 = vector.broadcast %335 : f32 to vector<16x128xf32>
    %337 = arith.mulf %14, %336 : vector<16x128xf32>
    %338 = arith.addf %334, %337 : vector<16x128xf32>
    %c46 = arith.constant 46 : index
    %339 = memref.load %arg1[%c46] : memref<141xf32, #tpu.memory_space<smem>>
    %340 = vector.broadcast %339 : f32 to vector<16x128xf32>
    %341 = arith.mulf %21, %340 : vector<16x128xf32>
    %342 = arith.addf %338, %341 : vector<16x128xf32>
    %c56 = arith.constant 56 : index
    %343 = memref.load %arg1[%c56] : memref<141xf32, #tpu.memory_space<smem>>
    %344 = vector.broadcast %343 : f32 to vector<16x128xf32>
    %345 = arith.mulf %28, %344 : vector<16x128xf32>
    %346 = arith.addf %342, %345 : vector<16x128xf32>
    %c66 = arith.constant 66 : index
    %347 = memref.load %arg1[%c66] : memref<141xf32, #tpu.memory_space<smem>>
    %348 = vector.broadcast %347 : f32 to vector<16x128xf32>
    %349 = arith.mulf %35, %348 : vector<16x128xf32>
    %350 = arith.addf %346, %349 : vector<16x128xf32>
    %c76 = arith.constant 76 : index
    %351 = memref.load %arg1[%c76] : memref<141xf32, #tpu.memory_space<smem>>
    %352 = vector.broadcast %351 : f32 to vector<16x128xf32>
    %353 = arith.mulf %42, %352 : vector<16x128xf32>
    %354 = arith.addf %350, %353 : vector<16x128xf32>
    %c86 = arith.constant 86 : index
    %355 = memref.load %arg1[%c86] : memref<141xf32, #tpu.memory_space<smem>>
    %356 = vector.broadcast %355 : f32 to vector<16x128xf32>
    %357 = arith.mulf %49, %356 : vector<16x128xf32>
    %358 = arith.addf %354, %357 : vector<16x128xf32>
    %c96 = arith.constant 96 : index
    %359 = memref.load %arg1[%c96] : memref<141xf32, #tpu.memory_space<smem>>
    %360 = vector.broadcast %359 : f32 to vector<16x128xf32>
    %361 = arith.mulf %56, %360 : vector<16x128xf32>
    %362 = arith.addf %358, %361 : vector<16x128xf32>
    %c106 = arith.constant 106 : index
    %363 = memref.load %arg1[%c106] : memref<141xf32, #tpu.memory_space<smem>>
    %364 = vector.broadcast %363 : f32 to vector<16x128xf32>
    %365 = arith.mulf %63, %364 : vector<16x128xf32>
    %366 = arith.addf %362, %365 : vector<16x128xf32>
    %c116 = arith.constant 116 : index
    %367 = memref.load %arg1[%c116] : memref<141xf32, #tpu.memory_space<smem>>
    %368 = vector.broadcast %367 : f32 to vector<16x128xf32>
    %369 = arith.mulf %70, %368 : vector<16x128xf32>
    %370 = arith.addf %366, %369 : vector<16x128xf32>
    %371 = math.tanh %370 : vector<16x128xf32>
    %c27 = arith.constant 27 : index
    %372 = memref.load %arg1[%c27] : memref<141xf32, #tpu.memory_space<smem>>
    %373 = vector.broadcast %372 : f32 to vector<16x128xf32>
    %374 = arith.mulf %7, %373 : vector<16x128xf32>
    %c127 = arith.constant 127 : index
    %375 = memref.load %arg1[%c127] : memref<141xf32, #tpu.memory_space<smem>>
    %376 = vector.broadcast %375 : f32 to vector<16x128xf32>
    %377 = arith.addf %374, %376 : vector<16x128xf32>
    %c37 = arith.constant 37 : index
    %378 = memref.load %arg1[%c37] : memref<141xf32, #tpu.memory_space<smem>>
    %379 = vector.broadcast %378 : f32 to vector<16x128xf32>
    %380 = arith.mulf %14, %379 : vector<16x128xf32>
    %381 = arith.addf %377, %380 : vector<16x128xf32>
    %c47 = arith.constant 47 : index
    %382 = memref.load %arg1[%c47] : memref<141xf32, #tpu.memory_space<smem>>
    %383 = vector.broadcast %382 : f32 to vector<16x128xf32>
    %384 = arith.mulf %21, %383 : vector<16x128xf32>
    %385 = arith.addf %381, %384 : vector<16x128xf32>
    %c57 = arith.constant 57 : index
    %386 = memref.load %arg1[%c57] : memref<141xf32, #tpu.memory_space<smem>>
    %387 = vector.broadcast %386 : f32 to vector<16x128xf32>
    %388 = arith.mulf %28, %387 : vector<16x128xf32>
    %389 = arith.addf %385, %388 : vector<16x128xf32>
    %c67 = arith.constant 67 : index
    %390 = memref.load %arg1[%c67] : memref<141xf32, #tpu.memory_space<smem>>
    %391 = vector.broadcast %390 : f32 to vector<16x128xf32>
    %392 = arith.mulf %35, %391 : vector<16x128xf32>
    %393 = arith.addf %389, %392 : vector<16x128xf32>
    %c77 = arith.constant 77 : index
    %394 = memref.load %arg1[%c77] : memref<141xf32, #tpu.memory_space<smem>>
    %395 = vector.broadcast %394 : f32 to vector<16x128xf32>
    %396 = arith.mulf %42, %395 : vector<16x128xf32>
    %397 = arith.addf %393, %396 : vector<16x128xf32>
    %c87 = arith.constant 87 : index
    %398 = memref.load %arg1[%c87] : memref<141xf32, #tpu.memory_space<smem>>
    %399 = vector.broadcast %398 : f32 to vector<16x128xf32>
    %400 = arith.mulf %49, %399 : vector<16x128xf32>
    %401 = arith.addf %397, %400 : vector<16x128xf32>
    %c97 = arith.constant 97 : index
    %402 = memref.load %arg1[%c97] : memref<141xf32, #tpu.memory_space<smem>>
    %403 = vector.broadcast %402 : f32 to vector<16x128xf32>
    %404 = arith.mulf %56, %403 : vector<16x128xf32>
    %405 = arith.addf %401, %404 : vector<16x128xf32>
    %c107 = arith.constant 107 : index
    %406 = memref.load %arg1[%c107] : memref<141xf32, #tpu.memory_space<smem>>
    %407 = vector.broadcast %406 : f32 to vector<16x128xf32>
    %408 = arith.mulf %63, %407 : vector<16x128xf32>
    %409 = arith.addf %405, %408 : vector<16x128xf32>
    %c117 = arith.constant 117 : index
    %410 = memref.load %arg1[%c117] : memref<141xf32, #tpu.memory_space<smem>>
    %411 = vector.broadcast %410 : f32 to vector<16x128xf32>
    %412 = arith.mulf %70, %411 : vector<16x128xf32>
    %413 = arith.addf %409, %412 : vector<16x128xf32>
    %414 = math.tanh %413 : vector<16x128xf32>
    %c28 = arith.constant 28 : index
    %415 = memref.load %arg1[%c28] : memref<141xf32, #tpu.memory_space<smem>>
    %416 = vector.broadcast %415 : f32 to vector<16x128xf32>
    %417 = arith.mulf %7, %416 : vector<16x128xf32>
    %c128 = arith.constant 128 : index
    %418 = memref.load %arg1[%c128] : memref<141xf32, #tpu.memory_space<smem>>
    %419 = vector.broadcast %418 : f32 to vector<16x128xf32>
    %420 = arith.addf %417, %419 : vector<16x128xf32>
    %c38 = arith.constant 38 : index
    %421 = memref.load %arg1[%c38] : memref<141xf32, #tpu.memory_space<smem>>
    %422 = vector.broadcast %421 : f32 to vector<16x128xf32>
    %423 = arith.mulf %14, %422 : vector<16x128xf32>
    %424 = arith.addf %420, %423 : vector<16x128xf32>
    %c48 = arith.constant 48 : index
    %425 = memref.load %arg1[%c48] : memref<141xf32, #tpu.memory_space<smem>>
    %426 = vector.broadcast %425 : f32 to vector<16x128xf32>
    %427 = arith.mulf %21, %426 : vector<16x128xf32>
    %428 = arith.addf %424, %427 : vector<16x128xf32>
    %c58 = arith.constant 58 : index
    %429 = memref.load %arg1[%c58] : memref<141xf32, #tpu.memory_space<smem>>
    %430 = vector.broadcast %429 : f32 to vector<16x128xf32>
    %431 = arith.mulf %28, %430 : vector<16x128xf32>
    %432 = arith.addf %428, %431 : vector<16x128xf32>
    %c68 = arith.constant 68 : index
    %433 = memref.load %arg1[%c68] : memref<141xf32, #tpu.memory_space<smem>>
    %434 = vector.broadcast %433 : f32 to vector<16x128xf32>
    %435 = arith.mulf %35, %434 : vector<16x128xf32>
    %436 = arith.addf %432, %435 : vector<16x128xf32>
    %c78 = arith.constant 78 : index
    %437 = memref.load %arg1[%c78] : memref<141xf32, #tpu.memory_space<smem>>
    %438 = vector.broadcast %437 : f32 to vector<16x128xf32>
    %439 = arith.mulf %42, %438 : vector<16x128xf32>
    %440 = arith.addf %436, %439 : vector<16x128xf32>
    %c88 = arith.constant 88 : index
    %441 = memref.load %arg1[%c88] : memref<141xf32, #tpu.memory_space<smem>>
    %442 = vector.broadcast %441 : f32 to vector<16x128xf32>
    %443 = arith.mulf %49, %442 : vector<16x128xf32>
    %444 = arith.addf %440, %443 : vector<16x128xf32>
    %c98 = arith.constant 98 : index
    %445 = memref.load %arg1[%c98] : memref<141xf32, #tpu.memory_space<smem>>
    %446 = vector.broadcast %445 : f32 to vector<16x128xf32>
    %447 = arith.mulf %56, %446 : vector<16x128xf32>
    %448 = arith.addf %444, %447 : vector<16x128xf32>
    %c108 = arith.constant 108 : index
    %449 = memref.load %arg1[%c108] : memref<141xf32, #tpu.memory_space<smem>>
    %450 = vector.broadcast %449 : f32 to vector<16x128xf32>
    %451 = arith.mulf %63, %450 : vector<16x128xf32>
    %452 = arith.addf %448, %451 : vector<16x128xf32>
    %c118 = arith.constant 118 : index
    %453 = memref.load %arg1[%c118] : memref<141xf32, #tpu.memory_space<smem>>
    %454 = vector.broadcast %453 : f32 to vector<16x128xf32>
    %455 = arith.mulf %70, %454 : vector<16x128xf32>
    %456 = arith.addf %452, %455 : vector<16x128xf32>
    %457 = math.tanh %456 : vector<16x128xf32>
    %c29 = arith.constant 29 : index
    %458 = memref.load %arg1[%c29] : memref<141xf32, #tpu.memory_space<smem>>
    %459 = vector.broadcast %458 : f32 to vector<16x128xf32>
    %460 = arith.mulf %7, %459 : vector<16x128xf32>
    %c129 = arith.constant 129 : index
    %461 = memref.load %arg1[%c129] : memref<141xf32, #tpu.memory_space<smem>>
    %462 = vector.broadcast %461 : f32 to vector<16x128xf32>
    %463 = arith.addf %460, %462 : vector<16x128xf32>
    %c39 = arith.constant 39 : index
    %464 = memref.load %arg1[%c39] : memref<141xf32, #tpu.memory_space<smem>>
    %465 = vector.broadcast %464 : f32 to vector<16x128xf32>
    %466 = arith.mulf %14, %465 : vector<16x128xf32>
    %467 = arith.addf %463, %466 : vector<16x128xf32>
    %c49 = arith.constant 49 : index
    %468 = memref.load %arg1[%c49] : memref<141xf32, #tpu.memory_space<smem>>
    %469 = vector.broadcast %468 : f32 to vector<16x128xf32>
    %470 = arith.mulf %21, %469 : vector<16x128xf32>
    %471 = arith.addf %467, %470 : vector<16x128xf32>
    %c59 = arith.constant 59 : index
    %472 = memref.load %arg1[%c59] : memref<141xf32, #tpu.memory_space<smem>>
    %473 = vector.broadcast %472 : f32 to vector<16x128xf32>
    %474 = arith.mulf %28, %473 : vector<16x128xf32>
    %475 = arith.addf %471, %474 : vector<16x128xf32>
    %c69 = arith.constant 69 : index
    %476 = memref.load %arg1[%c69] : memref<141xf32, #tpu.memory_space<smem>>
    %477 = vector.broadcast %476 : f32 to vector<16x128xf32>
    %478 = arith.mulf %35, %477 : vector<16x128xf32>
    %479 = arith.addf %475, %478 : vector<16x128xf32>
    %c79 = arith.constant 79 : index
    %480 = memref.load %arg1[%c79] : memref<141xf32, #tpu.memory_space<smem>>
    %481 = vector.broadcast %480 : f32 to vector<16x128xf32>
    %482 = arith.mulf %42, %481 : vector<16x128xf32>
    %483 = arith.addf %479, %482 : vector<16x128xf32>
    %c89 = arith.constant 89 : index
    %484 = memref.load %arg1[%c89] : memref<141xf32, #tpu.memory_space<smem>>
    %485 = vector.broadcast %484 : f32 to vector<16x128xf32>
    %486 = arith.mulf %49, %485 : vector<16x128xf32>
    %487 = arith.addf %483, %486 : vector<16x128xf32>
    %c99 = arith.constant 99 : index
    %488 = memref.load %arg1[%c99] : memref<141xf32, #tpu.memory_space<smem>>
    %489 = vector.broadcast %488 : f32 to vector<16x128xf32>
    %490 = arith.mulf %56, %489 : vector<16x128xf32>
    %491 = arith.addf %487, %490 : vector<16x128xf32>
    %c109 = arith.constant 109 : index
    %492 = memref.load %arg1[%c109] : memref<141xf32, #tpu.memory_space<smem>>
    %493 = vector.broadcast %492 : f32 to vector<16x128xf32>
    %494 = arith.mulf %63, %493 : vector<16x128xf32>
    %495 = arith.addf %491, %494 : vector<16x128xf32>
    %c119 = arith.constant 119 : index
    %496 = memref.load %arg1[%c119] : memref<141xf32, #tpu.memory_space<smem>>
    %497 = vector.broadcast %496 : f32 to vector<16x128xf32>
    %498 = arith.mulf %70, %497 : vector<16x128xf32>
    %499 = arith.addf %495, %498 : vector<16x128xf32>
    %500 = math.tanh %499 : vector<16x128xf32>
    %c130 = arith.constant 130 : index
    %501 = memref.load %arg1[%c130] : memref<141xf32, #tpu.memory_space<smem>>
    %502 = vector.broadcast %501 : f32 to vector<16x128xf32>
    %503 = arith.mulf %113, %502 : vector<16x128xf32>
    %c140 = arith.constant 140 : index
    %504 = memref.load %arg1[%c140] : memref<141xf32, #tpu.memory_space<smem>>
    %505 = vector.broadcast %504 : f32 to vector<16x128xf32>
    %506 = arith.addf %503, %505 : vector<16x128xf32>
    %c131 = arith.constant 131 : index
    %507 = memref.load %arg1[%c131] : memref<141xf32, #tpu.memory_space<smem>>
    %508 = vector.broadcast %507 : f32 to vector<16x128xf32>
    %509 = arith.mulf %156, %508 : vector<16x128xf32>
    %510 = arith.addf %506, %509 : vector<16x128xf32>
    %c132 = arith.constant 132 : index
    %511 = memref.load %arg1[%c132] : memref<141xf32, #tpu.memory_space<smem>>
    %512 = vector.broadcast %511 : f32 to vector<16x128xf32>
    %513 = arith.mulf %199, %512 : vector<16x128xf32>
    %514 = arith.addf %510, %513 : vector<16x128xf32>
    %c133 = arith.constant 133 : index
    %515 = memref.load %arg1[%c133] : memref<141xf32, #tpu.memory_space<smem>>
    %516 = vector.broadcast %515 : f32 to vector<16x128xf32>
    %517 = arith.mulf %242, %516 : vector<16x128xf32>
    %518 = arith.addf %514, %517 : vector<16x128xf32>
    %c134 = arith.constant 134 : index
    %519 = memref.load %arg1[%c134] : memref<141xf32, #tpu.memory_space<smem>>
    %520 = vector.broadcast %519 : f32 to vector<16x128xf32>
    %521 = arith.mulf %285, %520 : vector<16x128xf32>
    %522 = arith.addf %518, %521 : vector<16x128xf32>
    %c135 = arith.constant 135 : index
    %523 = memref.load %arg1[%c135] : memref<141xf32, #tpu.memory_space<smem>>
    %524 = vector.broadcast %523 : f32 to vector<16x128xf32>
    %525 = arith.mulf %328, %524 : vector<16x128xf32>
    %526 = arith.addf %522, %525 : vector<16x128xf32>
    %c136 = arith.constant 136 : index
    %527 = memref.load %arg1[%c136] : memref<141xf32, #tpu.memory_space<smem>>
    %528 = vector.broadcast %527 : f32 to vector<16x128xf32>
    %529 = arith.mulf %371, %528 : vector<16x128xf32>
    %530 = arith.addf %526, %529 : vector<16x128xf32>
    %c137 = arith.constant 137 : index
    %531 = memref.load %arg1[%c137] : memref<141xf32, #tpu.memory_space<smem>>
    %532 = vector.broadcast %531 : f32 to vector<16x128xf32>
    %533 = arith.mulf %414, %532 : vector<16x128xf32>
    %534 = arith.addf %530, %533 : vector<16x128xf32>
    %c138 = arith.constant 138 : index
    %535 = memref.load %arg1[%c138] : memref<141xf32, #tpu.memory_space<smem>>
    %536 = vector.broadcast %535 : f32 to vector<16x128xf32>
    %537 = arith.mulf %457, %536 : vector<16x128xf32>
    %538 = arith.addf %534, %537 : vector<16x128xf32>
    %c139 = arith.constant 139 : index
    %539 = memref.load %arg1[%c139] : memref<141xf32, #tpu.memory_space<smem>>
    %540 = vector.broadcast %539 : f32 to vector<16x128xf32>
    %541 = arith.mulf %500, %540 : vector<16x128xf32>
    %542 = arith.addf %538, %541 : vector<16x128xf32>
    %c0_2 = arith.constant 0 : index
    %c0_3 = arith.constant 0 : index
    %543 = vector.load %arg3[%c0_2, %c0_3] : memref<16x128xf32, #tpu.memory_space<vmem>>, vector<16x128xf32>
    tpu.vector_store %arg3[%c0_2, %c0_3], %542 {strides = array<i32>} : memref<16x128xf32, #tpu.memory_space<vmem>>, vector<16x128xf32>,
    return
  }
  func.func @transform_0(%arg0: i32) -> i32 {
    %c0_i32 = arith.constant 0 : i32
    %c0_i32_0 = arith.constant 0 : i32
    return %c0_i32 : i32
  }
  func.func @transform_1(%arg0: i32) -> (i32, i32) {
    %c0_i32 = arith.constant 0 : i32
    %c0_i32_0 = arith.constant 0 : i32
    return %arg0, %c0_i32 : i32, i32
  }
  func.func @transform_2(%arg0: i32) -> (i32, i32) {
    %c0_i32 = arith.constant 0 : i32
    %c0_i32_0 = arith.constant 0 : i32
    return %arg0, %c0_i32 : i32, i32
  }
}

</mosaic_0001>

<bundles_post_ra>
// kernel: tpu_custom_call.1
= control target key start
LH: loop header
LB: loop body
LE: loop exit
PB: predicated region body
PF: predicated region fallthrough
CT: control target
= control target key end

     0   :  { %7 = vsyncpa [#allocation5], 0  ;;  %s1910_s0 = inlined_call_operand.hbm [shape: f32[141], index: 0, kind: input, shape index: {}]   ;;  %s1911_s1 = inlined_call_operand.hbm [shape: f32[16,128], index: 1, kind: input, shape index: {}]   ;;  %s1912_s2 = inlined_call_operand.hbm [shape: f32[16,128], index: 2, kind: output, shape index: {}]  }
   0x1   :  { %8 = vsyncpa [#allocation3], 0 }
   0x2   :  { %9 = vsyncpa [#allocation4], 0  ;;  %s15_s11 = sshll.u32 %s1910_s0, 4  ;;  %s23_s14 = sshll.u32 %s1911_s1, 4  ;;  %s16_s11 = int_to_ptr.hbm [resolvable:$true] %s15_s11  ;;  %s24_s14 = int_to_ptr.hbm [resolvable:$true] %s23_s14 }
   0x3   :  { %s1158_s15 = smov [#allocation2]   ;;  %s1159_s16 = smov [#allocation6]  }
   0x4   :  { %18 = dma.hbm_to_smem %s16_s11, 32, %s1158_s15, [#allocation5]  }
   0x5   :  { %s25_s17 = sshll.u32 %s1159_s16, 4  ;;  %s1160_s18 = smov 128   ;;  %s26_s17 = int_to_ptr.vmem [resolvable:$true] %s25_s17 }
   0x6   :  { %s1161_s19 = smov 8  }
   0x7   :  { %31 = dma.hbm_to_vmem [thread:$0]  %s24_s14, 256, %s26_s17, [#allocation3], %s1160_s18, %s1160_s18, %s1161_s19  }
   0x8   :  { %1152 = dma.done.wait [#allocation5], 32  }
   0x9   :  { %1153 = vsyncadd [#allocation5], 4294967264 }
   0xa   :  { %1154 = dma.done.wait [#allocation3], 256  }
   0xb   :  { %1155 = vsyncadd [#allocation3], 4294967040 }
   0xc   :  { %40 = sfence }
   0xd   :  { %s43_s0 = sld [smem:[#allocation2]]  ;;  %v1187_v0 = vld [vmem:[#allocation6] sm:$0xff]  ;;  %v1189_v1 = vld [vmem:[#allocation6 + $0x8] sm:$0xff] }
   0xe   :  { %s867_s20 = sld [smem:[#allocation2 + $0xa]] }
   0xf   :  { %s868_s1 = sld [smem:[#allocation2 + $0x1]] }
  0x10   :  { %s869_s21 = sld [smem:[#allocation2 + $0xb]] }
  0x11   :  { %s870_s22 = sld [smem:[#allocation2 + $0x2]] }
  0x12   :  { %s1191_s23 = sld [smem:[#allocation2 + $0xc]] }
  0x13   :  { %v44_v2 = vstv %s43_s0  ;;  %s872_s24 = sld [smem:[#allocation2 + $0x3]] }
  0x14   :  { %v45_v3 = vmul.f32 %v44_v2, %v1187_v0  ;;  %v46_v4 = vmul.f32 %v44_v2, %v1189_v1  ;;  %v48_v5 = vstv %s867_s20  ;;  %s1195_s25 = sld [smem:[#allocation2 + $0xd]] }
  0x15   :  { %v54_v6 = vstv %s868_s1  ;;  %s1197_s26 = sld [smem:[#allocation2 + $0x4]] }
  0x16   :  { %v49_v7 = vadd.f32 %v48_v5, %v45_v3  ;;  %v50_v8 = vadd.f32 %v48_v5, %v46_v4  ;;  %v55_v9 = vmul.f32 %v54_v6, %v1187_v0  ;;  %v56_v10 = vmul.f32 %v54_v6, %v1189_v1  ;;  %s1201_s27 = sld [smem:[#allocation2 + $0xe]] }
  0x17   :  { %v58_v11 = vstv %s869_s21  ;;  %v64_v12 = vstv %s870_s22  ;;  %s1203_s28 = sld [smem:[#allocation2 + $0x5]] }
  0x18   :  { %1012 = vtanh.f32 %v49_v7  ;;  %v59_v13 = vadd.f32 %v58_v11, %v55_v9  ;;  %v60_v14 = vadd.f32 %v58_v11, %v56_v10  ;;  %v65_v15 = vmul.f32 %v64_v12, %v1187_v0  ;;  %s1206_s29 = sld [smem:[#allocation2 + $0xf]] }
  0x19   :  { %1014 = vtanh.f32 %v50_v8  ;;  %v66_v16 = vmul.f32 %v64_v12, %v1189_v1  ;;  %v68_v17 = vstv %s1191_s23  ;;  %v74_v18 = vstv %s872_s24  ;;  %s1210_s30 = sld [smem:[#allocation2 + $0x6]] }
  0x1a   :  { %1016 = vtanh.f32 %v59_v13  ;;  %v69_v19 = vadd.f32 %v68_v17, %v65_v15  ;;  %v75_v20 = vmul.f32 %v74_v18, %v1187_v0  ;;  %v76_v21 = vmul.f32 %v74_v18, %v1189_v1  ;;  %s1214_s3 = sld [smem:[#allocation2 + $0x10]] }
  0x1b   :  { %1018 = vtanh.f32 %v60_v14  ;;  %v70_v22 = vadd.f32 %v68_v17, %v66_v16  ;;  %v78_v23 = vstv %s1195_s25  ;;  %v84_v24 = vstv %s1197_s26  ;;  %s1218_s4 = sld [smem:[#allocation2 + $0x7]] }
  0x1c   :  { %1020 = vtanh.f32 %v69_v19  ;;  %v79_v25 = vadd.f32 %v78_v23, %v75_v20  ;;  %v80_v26 = vadd.f32 %v78_v23, %v76_v21  ;;  %v85_v27 = vmul.f32 %v84_v24, %v1187_v0  ;;  %s1221_s5 = sld [smem:[#allocation2 + $0x11]] }
  0x1d   :  { %1022 = vtanh.f32 %v70_v22  ;;  %v86_v28 = vmul.f32 %v84_v24, %v1189_v1  ;;  %v88_v29 = vstv %s1201_s27  ;;  %v94_v30 = vstv %s1203_s28  ;;  %s1226_s6 = sld [smem:[#allocation2 + $0x8]] }
  0x1e   :  { %v1228_v31 = vpop.eup %1012  ;;  %1024 = vtanh.f32 %v79_v25  ;;  %v89_v32 = vadd.f32 %v88_v29, %v85_v27  ;;  %v95_v33 = vmul.f32 %v94_v30, %v1187_v0  ;;  %v96_v34 = vmul.f32 %v94_v30, %v1189_v1  ;;  %s1232_s7 = sld [smem:[#allocation2 + $0x12]] }
  0x1f   :  { %v1234_v35 = vpop.eup %1014  ;;  %1026 = vtanh.f32 %v80_v26  ;;  %v90_v36 = vadd.f32 %v88_v29, %v86_v28  ;;  %v98_v37 = vstv %s1206_s29  ;;  %v104_v38 = vstv %s1210_s30  ;;  %s1238_s8 = sld [smem:[#allocation2 + $0x9]] }
  0x20   :  { %v1240_v39 = vpop.eup %1016  ;;  %1028 = vtanh.f32 %v89_v32  ;;  %v99_v40 = vadd.f32 %v98_v37, %v95_v33  ;;  %v100_v41 = vadd.f32 %v98_v37, %v96_v34  ;;  %v105_v42 = vmul.f32 %v104_v38, %v1187_v0  ;;  %s1243_s9 = sld [smem:[#allocation2 + $0x13]] }
  0x21   :  { %v1245_v43 = vpop.eup %1018  ;;  %1030 = vtanh.f32 %v90_v36  ;;  %v106_v44 = vmul.f32 %v104_v38, %v1189_v1  ;;  %v108_v45 = vstv %s1214_s3  ;;  %v114_v46 = vstv %s1218_s4  ;;  %s1250_s10 = sld [smem:[#allocation2 + $0x14]] }
  0x22   :  { %v1252_v47 = vpop.eup %1020  ;;  %1032 = vtanh.f32 %v99_v40  ;;  %v109_v48 = vadd.f32 %v108_v45, %v105_v42  ;;  %v115_v49 = vmul.f32 %v114_v46, %v1187_v0  ;;  %v116_v50 = vmul.f32 %v114_v46, %v1189_v1  ;;  %s1256_s11 = sld [smem:[#allocation2 + $0x78]] }
  0x23   :  { %v1258_v51 = vpop.eup %1022  ;;  %1034 = vtanh.f32 %v100_v41  ;;  %v110_v52 = vadd.f32 %v108_v45, %v106_v44  ;;  %v118_v53 = vstv %s1221_s5  ;;  %v124_v54 = vstv %s1226_s6  ;;  %s1262_s12 = sld [smem:[#allocation2 + $0x1e]] }
  0x24   :  { %v1264_v55 = vpop.eup %1024  ;;  %1036 = vtanh.f32 %v109_v48  ;;  %v119_v56 = vadd.f32 %v118_v53, %v115_v49  ;;  %v120_v57 = vadd.f32 %v118_v53, %v116_v50  ;;  %v125_v58 = vmul.f32 %v124_v54, %v1187_v0  ;;  %s1267_s13 = sld [smem:[#allocation2 + $0x28]] }
  0x25   :  { %v1269_v59 = vpop.eup %1026  ;;  %1038 = vtanh.f32 %v110_v52  ;;  %v126_v60 = vmul.f32 %v124_v54, %v1189_v1  ;;  %v128_v61 = vstv %s1232_s7  ;;  %v134_v62 = vstv %s1238_s8  ;;  %s1274_s14 = sld [smem:[#allocation2 + $0x32]] }
  0x26   :  { %v1276_v63 = vpop.eup %1028  ;;  %1040 = vtanh.f32 %v119_v56  ;;  %v129_v2 = vadd.f32 %v128_v61, %v125_v58  ;;  %v135_v3 = vmul.f32 %v134_v62, %v1187_v0  ;;  %v136_v4 = vmul.f32 %v134_v62, %v1189_v1  ;;  %s1280_s15 = sld [smem:[#allocation2 + $0x3c]] }
  0x27   :  { %v1282_v5 = vpop.eup %1030  ;;  %1042 = vtanh.f32 %v120_v57  ;;  %v130_v6 = vadd.f32 %v128_v61, %v126_v60  ;;  %v138_v7 = vstv %s1243_s9  ;;  %v144_v8 = vstv %s1250_s10  ;;  %s1286_s16 = sld [smem:[#allocation2 + $0x46]] }
  0x28   :  { %v1288_v9 = vpop.eup %1032  ;;  %1044 = vtanh.f32 %v129_v2  ;;  %v139_v10 = vadd.f32 %v138_v7, %v135_v3  ;;  %v140_v11 = vadd.f32 %v138_v7, %v136_v4  ;;  %v145_v0 = vmul.f32 %v1228_v31, %v144_v8  ;;  %s1291_s17 = sld [smem:[#allocation2 + $0x50]] }
  0x29   :  { %v1293_v1 = vpop.eup %1034  ;;  %1046 = vtanh.f32 %v130_v6  ;;  %v146_v12 = vmul.f32 %v1234_v35, %v144_v8  ;;  %v148_v13 = vstv %s1256_s11  ;;  %v152_v14 = vstv %s1262_s12  ;;  %s1298_s0 = sld [smem:[#allocation2 + $0x5a]] }
  0x2a   :  { %v1300_v15 = vpop.eup %1036  ;;  %1048 = vtanh.f32 %v139_v10  ;;  %v149_v16 = vadd.f32 %v148_v13, %v145_v0  ;;  %v153_v17 = vmul.f32 %v1240_v39, %v152_v14  ;;  %v154_v18 = vmul.f32 %v1245_v43, %v152_v14  ;;  %s1304_s20 = sld [smem:[#allocation2 + $0x64]] }
  0x2b   :  { %v1306_v19 = vpop.eup %1038  ;;  %1050 = vtanh.f32 %v140_v11  ;;  %v150_v20 = vadd.f32 %v148_v13, %v146_v12  ;;  %v158_v21 = vstv %s1267_s13  ;;  %v164_v22 = vstv %s1274_s14  ;;  %s1310_s1 = sld [smem:[#allocation2 + $0x6e]] }
  0x2c   :  { %v1312_v23 = vpop.eup %1040  ;;  %v155_v24 = vadd.f32 %v153_v17, %v149_v16  ;;  %v159_v25 = vmul.f32 %v1252_v47, %v158_v21  ;;  %v160_v26 = vmul.f32 %v1258_v51, %v158_v21  ;;  %v165_v27 = vmul.f32 %v1264_v55, %v164_v22  ;;  %s1317_s21 = sld [smem:[#allocation2 + $0x15]] }
  0x2d   :  { %v1319_v28 = vpop.eup %1042  ;;  %v156_v29 = vadd.f32 %v154_v18, %v150_v20  ;;  %v166_v30 = vmul.f32 %v1269_v59, %v164_v22  ;;  %v170_v32 = vstv %s1280_s15  ;;  %v176_v33 = vstv %s1286_s16  ;;  %s1324_s22 = sld [smem:[#allocation2 + $0x79]] }
  0x2e   :  { %v1326_v34 = vpop.eup %1044  ;;  %v161_v36 = vadd.f32 %v159_v25, %v155_v24  ;;  %v171_v37 = vmul.f32 %v1276_v63, %v170_v32  ;;  %v172_v38 = vmul.f32 %v1282_v5, %v170_v32  ;;  %v177_v40 = vmul.f32 %v1288_v9, %v176_v33  ;;  %s1331_s23 = sld [smem:[#allocation2 + $0x1f]] }
  0x2f   :  { %v1333_v41 = vpop.eup %1046  ;;  %v162_v42 = vadd.f32 %v160_v26, %v156_v29  ;;  %v178_v44 = vmul.f32 %v1293_v1, %v176_v33  ;;  %v182_v45 = vstv %s1291_s17  ;;  %v188_v46 = vstv %s1298_s0  ;;  %s1338_s24 = sld [smem:[#allocation2 + $0x29]] }
  0x30   :  { %v1340_v48 = vpop.eup %1048  ;;  %v167_v49 = vadd.f32 %v165_v27, %v161_v36  ;;  %v183_v50 = vmul.f32 %v1300_v15, %v182_v45  ;;  %v184_v52 = vmul.f32 %v1306_v19, %v182_v45  ;;  %v189_v53 = vmul.f32 %v1312_v23, %v188_v46  ;;  %s1345_s25 = sld [smem:[#allocation2 + $0x33]] }
  0x31   :  { %v1347_v54 = vpop.eup %1050  ;;  %v168_v56 = vadd.f32 %v166_v30, %v162_v42  ;;  %v190_v57 = vmul.f32 %v1319_v28, %v188_v46  ;;  %v194_v58 = vstv %s1304_s20  ;;  %v200_v60 = vstv %s1310_s1  ;;  %s1352_s26 = sld [smem:[#allocation2 + $0x3d]] }
  0x32   :  { %v173_v61 = vadd.f32 %v171_v37, %v167_v49  ;;  %v195_v62 = vmul.f32 %v1326_v34, %v194_v58  ;;  %v196_v2 = vmul.f32 %v1333_v41, %v194_v58  ;;  %v201_v3 = vmul.f32 %v1340_v48, %v200_v60  ;;  %s1357_s27 = sld [smem:[#allocation2 + $0x47]] }
  0x33   :  { %v174_v4 = vadd.f32 %v172_v38, %v168_v56  ;;  %v202_v6 = vmul.f32 %v1347_v54, %v200_v60  ;;  %v208_v7 = vstv %s1317_s21  ;;  %v212_v8 = vstv %s1324_s22  ;;  %s1362_s28 = sld [smem:[#allocation2 + $0x51]] }
  0x34   :  { %v179_v10 = vadd.f32 %v177_v40, %v173_v61  ;;  %v209_v11 = vmul.f32 %v1228_v31, %v208_v7  ;;  %v210_v0 = vmul.f32 %v1234_v35, %v208_v7  ;;  %v216_v12 = vstv %s1331_s23  ;;  %s1367_s29 = sld [smem:[#allocation2 + $0x5b]] }
  0x35   :  { %v180_v13 = vadd.f32 %v178_v44, %v174_v4  ;;  %v217_v14 = vmul.f32 %v1240_v39, %v216_v12  ;;  %v218_v16 = vmul.f32 %v1245_v43, %v216_v12  ;;  %v222_v17 = vstv %s1338_s24  ;;  %s1372_s30 = sld [smem:[#allocation2 + $0x65]] }
  0x36   :  { %v185_v18 = vadd.f32 %v183_v50, %v179_v10  ;;  %v213_v20 = vadd.f32 %v212_v8, %v209_v11  ;;  %v214_v21 = vadd.f32 %v212_v8, %v210_v0  ;;  %v223_v22 = vmul.f32 %v1252_v47, %v222_v17  ;;  %s1378_s3 = sld [smem:[#allocation2 + $0x6f]] }
  0x37   :  { %v186_v24 = vadd.f32 %v184_v52, %v180_v13  ;;  %v224_v25 = vmul.f32 %v1258_v51, %v222_v17  ;;  %v228_v26 = vstv %s1345_s25  ;;  %v234_v27 = vstv %s1352_s26  ;;  %s1381_s4 = sld [smem:[#allocation2 + $0x16]] }
  0x38   :  { %v191_v29 = vadd.f32 %v189_v53, %v185_v18  ;;  %v219_v30 = vadd.f32 %v217_v14, %v213_v20  ;;  %v220_v32 = vadd.f32 %v218_v16, %v214_v21  ;;  %v229_v33 = vmul.f32 %v1264_v55, %v228_v26  ;;  %s1386_s5 = sld [smem:[#allocation2 + $0x7a]] }
  0x39   :  { %v192_v36 = vadd.f32 %v190_v57, %v186_v24  ;;  %v230_v37 = vmul.f32 %v1269_v59, %v228_v26  ;;  %v235_v38 = vmul.f32 %v1276_v63, %v234_v27  ;;  %v236_v40 = vmul.f32 %v1282_v5, %v234_v27  ;;  %s1389_s6 = sld [smem:[#allocation2 + $0x20]] }
  0x3a   :  { %v197_v42 = vadd.f32 %v195_v62, %v191_v29  ;;  %v225_v44 = vadd.f32 %v223_v22, %v219_v30  ;;  %v226_v45 = vadd.f32 %v224_v25, %v220_v32  ;;  %v240_v46 = vstv %s1357_s27  ;;  %s1394_s7 = sld [smem:[#allocation2 + $0x2a]] }
  0x3b   :  { %v198_v49 = vadd.f32 %v196_v2, %v192_v36  ;;  %v241_v50 = vmul.f32 %v1288_v9, %v240_v46  ;;  %v242_v52 = vmul.f32 %v1293_v1, %v240_v46  ;;  %v246_v53 = vstv %s1362_s28  ;;  %s1397_s8 = sld [smem:[#allocation2 + $0x34]] }
  0x3c   :  { %v203_v56 = vadd.f32 %v201_v3, %v197_v42  ;;  %v231_v57 = vadd.f32 %v229_v33, %v225_v44  ;;  %v232_v58 = vadd.f32 %v230_v37, %v226_v45  ;;  %v247_v60 = vmul.f32 %v1300_v15, %v246_v53  ;;  %s1402_s9 = sld [smem:[#allocation2 + $0x3e]] }
  0x3d   :  { %v204_v61 = vadd.f32 %v202_v6, %v198_v49  ;;  %v248_v62 = vmul.f32 %v1306_v19, %v246_v53  ;;  %v252_v4 = vstv %s1367_s29  ;;  %v258_v2 = vstv %s1372_s30  ;;  %s1405_s10 = sld [smem:[#allocation2 + $0x48]] }
  0x3e   :  { %1052 = vtanh.f32 %v203_v56  ;;  %v237_v7 = vadd.f32 %v235_v38, %v231_v57  ;;  %v238_v8 = vadd.f32 %v236_v40, %v232_v58  ;;  %v253_v3 = vmul.f32 %v1312_v23, %v252_v4  ;;  %s1410_s11 = sld [smem:[#allocation2 + $0x52]] }
  0x3f   :  { %1054 = vtanh.f32 %v204_v61  ;;  %v254_v10 = vmul.f32 %v1319_v28, %v252_v4  ;;  %v259_v6 = vmul.f32 %v1326_v34, %v258_v2  ;;  %v260_v11 = vmul.f32 %v1333_v41, %v258_v2  ;;  %s1414_s12 = sld [smem:[#allocation2 + $0x5c]] }
  0x40   :  { %v243_v0 = vadd.f32 %v241_v50, %v237_v7  ;;  %v244_v12 = vadd.f32 %v242_v52, %v238_v8  ;;  %v264_v13 = vstv %s1378_s3  ;;  %v272_v14 = vstv %s1381_s4  ;;  %s1420_s13 = sld [smem:[#allocation2 + $0x66]] }
  0x41   :  { %v265_v16 = vmul.f32 %v1340_v48, %v264_v13  ;;  %v266_v17 = vmul.f32 %v1347_v54, %v264_v13  ;;  %v273_v18 = vmul.f32 %v1228_v31, %v272_v14  ;;  %v274_v20 = vmul.f32 %v1234_v35, %v272_v14  ;;  %s1424_s14 = sld [smem:[#allocation2 + $0x70]] }
  0x42   :  { %v249_v21 = vadd.f32 %v247_v60, %v243_v0  ;;  %v250_v22 = vadd.f32 %v248_v62, %v244_v12  ;;  %v276_v24 = vstv %s1386_s5  ;;  %v280_v25 = vstv %s1389_s6  ;;  %s1428_s15 = sld [smem:[#allocation2 + $0x17]] }
  0x43   :  { %v277_v26 = vadd.f32 %v276_v24, %v273_v18  ;;  %v278_v27 = vadd.f32 %v276_v24, %v274_v20  ;;  %v281_v29 = vmul.f32 %v1240_v39, %v280_v25  ;;  %v282_v30 = vmul.f32 %v1245_v43, %v280_v25  ;;  %s1434_s16 = sld [smem:[#allocation2 + $0x7b]] }
  0x44   :  { %v1430_v32 = vpop.eup %1052  ;;  %v255_v33 = vadd.f32 %v253_v3, %v249_v21  ;;  %v256_v36 = vadd.f32 %v254_v10, %v250_v22  ;;  %v286_v37 = vstv %s1394_s7  ;;  %v292_v38 = vstv %s1397_s8  ;;  %s1440_s17 = sld [smem:[#allocation2 + $0x21]] }
  0x45   :  { %v1436_v40 = vpop.eup %1054  ;;  %v283_v42 = vadd.f32 %v281_v29, %v277_v26  ;;  %v284_v44 = vadd.f32 %v282_v30, %v278_v27  ;;  %v287_v45 = vmul.f32 %v1252_v47, %v286_v37  ;;  %v288_v46 = vmul.f32 %v1258_v51, %v286_v37  ;;  %s1444_s0 = sld [smem:[#allocation2 + $0x2b]] }
  0x46   :  { %v261_v49 = vadd.f32 %v259_v6, %v255_v33  ;;  %v262_v50 = vadd.f32 %v260_v11, %v256_v36  ;;  %v293_v52 = vmul.f32 %v1264_v55, %v292_v38  ;;  %v294_v53 = vmul.f32 %v1269_v59, %v292_v38  ;;  %s1448_s20 = sld [smem:[#allocation2 + $0x35]] }
  0x47   :  { %v289_v56 = vadd.f32 %v287_v45, %v283_v42  ;;  %v290_v57 = vadd.f32 %v288_v46, %v284_v44  ;;  %v298_v58 = vstv %s1402_s9  ;;  %v304_v60 = vstv %s1405_s10  ;;  %s1452_s1 = sld [smem:[#allocation2 + $0x3f]] }
  0x48   :  { %v267_v61 = vadd.f32 %v265_v16, %v261_v49  ;;  %v268_v62 = vadd.f32 %v266_v17, %v262_v50  ;;  %v299_v4 = vmul.f32 %v1276_v63, %v298_v58  ;;  %v300_v2 = vmul.f32 %v1282_v5, %v298_v58  ;;  %s1464_s21 = sld [smem:[#allocation2 + $0x49]] }
  0x49   :  { %v295_v7 = vadd.f32 %v293_v52, %v289_v56  ;;  %v296_v8 = vadd.f32 %v294_v53, %v290_v57  ;;  %v305_v3 = vmul.f32 %v1288_v9, %v304_v60  ;;  %v306_v10 = vmul.f32 %v1293_v1, %v304_v60  ;;  %s1468_s22 = sld [smem:[#allocation2 + $0x53]] }
  0x4a   :  { %1056 = vtanh.f32 %v267_v61  ;;  %v310_v6 = vstv %s1410_s11  ;;  %v316_v11 = vstv %s1414_s12  ;;  %v322_v0 = vstv %s1420_s13  ;;  %s1474_s23 = sld [smem:[#allocation2 + $0x5d]] }
  0x4b   :  { %1058 = vtanh.f32 %v268_v62  ;;  %v301_v12 = vadd.f32 %v299_v4, %v295_v7  ;;  %v302_v13 = vadd.f32 %v300_v2, %v296_v8  ;;  %v311_v14 = vmul.f32 %v1300_v15, %v310_v6  ;;  %s1478_s24 = sld [smem:[#allocation2 + $0x67]] }
  0x4c   :  { %v312_v16 = vmul.f32 %v1306_v19, %v310_v6  ;;  %v317_v17 = vmul.f32 %v1312_v23, %v316_v11  ;;  %v318_v18 = vmul.f32 %v1319_v28, %v316_v11  ;;  %v323_v20 = vmul.f32 %v1326_v34, %v322_v0  ;;  %s1486_s25 = sld [smem:[#allocation2 + $0x71]] }
  0x4d   :  { %v307_v21 = vadd.f32 %v305_v3, %v301_v12  ;;  %v308_v22 = vadd.f32 %v306_v10, %v302_v13  ;;  %v324_v24 = vmul.f32 %v1333_v41, %v322_v0  ;;  %v328_v25 = vstv %s1424_s14  ;;  %s1490_s26 = sld [smem:[#allocation2 + $0x18]] }
  0x4e   :  { %v329_v26 = vmul.f32 %v1340_v48, %v328_v25  ;;  %v330_v27 = vmul.f32 %v1347_v54, %v328_v25  ;;  %v336_v29 = vstv %s1428_s15  ;;  %v340_v30 = vstv %s1434_s16  ;;  %s1498_s27 = sld [smem:[#allocation2 + $0x7c]] }
  0x4f   :  { %v313_v33 = vadd.f32 %v311_v14, %v307_v21  ;;  %v314_v36 = vadd.f32 %v312_v16, %v308_v22  ;;  %v337_v37 = vmul.f32 %v1228_v31, %v336_v29  ;;  %v338_v38 = vmul.f32 %v1234_v35, %v336_v29  ;;  %s1502_s28 = sld [smem:[#allocation2 + $0x22]] }
  0x50   :  { %v1480_v42 = vpop.eup %1056  ;;  %v344_v44 = vstv %s1440_s17  ;;  %v350_v45 = vstv %s1444_s0  ;;  %v356_v46 = vstv %s1448_s20  ;;  %v362_v49 = vstv %s1452_s1  ;;  %s1506_s29 = sld [smem:[#allocation2 + $0x2c]] }
  0x51   :  { %v1488_v50 = vpop.eup %1058  ;;  %v319_v52 = vadd.f32 %v317_v17, %v313_v33  ;;  %v320_v53 = vadd.f32 %v318_v18, %v314_v36  ;;  %v341_v56 = vadd.f32 %v340_v30, %v337_v37  ;;  %v342_v57 = vadd.f32 %v340_v30, %v338_v38  ;;  %s1510_s30 = sld [smem:[#allocation2 + $0x36]] }
  0x52   :  { %v345_v58 = vmul.f32 %v1240_v39, %v344_v44  ;;  %v346_v60 = vmul.f32 %v1245_v43, %v344_v44  ;;  %v351_v61 = vmul.f32 %v1252_v47, %v350_v45  ;;  %v352_v62 = vmul.f32 %v1258_v51, %v350_v45  ;;  %s1516_s3 = sld [smem:[#allocation2 + $0x40]] }
  0x53   :  { %v325_v4 = vadd.f32 %v323_v20, %v319_v52  ;;  %v326_v2 = vadd.f32 %v324_v24, %v320_v53  ;;  %v357_v7 = vmul.f32 %v1264_v55, %v356_v46  ;;  %v358_v8 = vmul.f32 %v1269_v59, %v356_v46  ;;  %s1522_s4 = sld [smem:[#allocation2 + $0x4a]] }
  0x54   :  { %v347_v3 = vadd.f32 %v345_v58, %v341_v56  ;;  %v348_v10 = vadd.f32 %v346_v60, %v342_v57  ;;  %v363_v6 = vmul.f32 %v1276_v63, %v362_v49  ;;  %v364_v11 = vmul.f32 %v1282_v5, %v362_v49  ;;  %s1530_s5 = sld [smem:[#allocation2 + $0x54]] }
  0x55   :  { %v331_v0 = vadd.f32 %v329_v26, %v325_v4  ;;  %v332_v12 = vadd.f32 %v330_v27, %v326_v2  ;;  %v368_v13 = vstv %s1464_s21  ;;  %v374_v14 = vstv %s1468_s22  ;;  %s1534_s6 = sld [smem:[#allocation2 + $0x5e]] }
  0x56   :  { %v353_v16 = vadd.f32 %v351_v61, %v347_v3  ;;  %v354_v17 = vadd.f32 %v352_v62, %v348_v10  ;;  %v369_v18 = vmul.f32 %v1288_v9, %v368_v13  ;;  %v370_v20 = vmul.f32 %v1293_v1, %v368_v13  ;;  %s1540_s7 = sld [smem:[#allocation2 + $0x68]] }
  0x57   :  { %1060 = vtanh.f32 %v331_v0  ;;  %v375_v21 = vmul.f32 %v1300_v15, %v374_v14  ;;  %v376_v22 = vmul.f32 %v1306_v19, %v374_v14  ;;  %v380_v24 = vstv %s1474_s23  ;;  %s1546_s8 = sld [smem:[#allocation2 + $0x72]] }
  0x58   :  { %1062 = vtanh.f32 %v332_v12  ;;  %v359_v25 = vadd.f32 %v357_v7, %v353_v16  ;;  %v360_v26 = vadd.f32 %v358_v8, %v354_v17  ;;  %v381_v27 = vmul.f32 %v1312_v23, %v380_v24  ;;  %s1550_s9 = sld [smem:[#allocation2 + $0x19]] }
  0x59   :  { %v382_v29 = vmul.f32 %v1319_v28, %v380_v24  ;;  %v386_v30 = vstv %s1478_s24  ;;  %v392_v33 = vstv %s1486_s25  ;;  %v400_v36 = vstv %s1490_s26  ;;  %s1554_s10 = sld [smem:[#allocation2 + $0x7d]] }
  0x5a   :  { %v365_v37 = vadd.f32 %v363_v6, %v359_v25  ;;  %v366_v38 = vadd.f32 %v364_v11, %v360_v26  ;;  %v387_v44 = vmul.f32 %v1326_v34, %v386_v30  ;;  %v388_v45 = vmul.f32 %v1333_v41, %v386_v30  ;;  %s1558_s11 = sld [smem:[#allocation2 + $0x23]] }
  0x5b   :  { %v393_v46 = vmul.f32 %v1340_v48, %v392_v33  ;;  %v394_v49 = vmul.f32 %v1347_v54, %v392_v33  ;;  %v401_v52 = vmul.f32 %v1228_v31, %v400_v36  ;;  %v402_v53 = vmul.f32 %v1234_v35, %v400_v36  ;;  %s1562_s12 = sld [smem:[#allocation2 + $0x2d]] }
  0x5c   :  { %v371_v56 = vadd.f32 %v369_v18, %v365_v37  ;;  %v372_v57 = vadd.f32 %v370_v20, %v366_v38  ;;  %v404_v58 = vstv %s1498_s27  ;;  %v408_v60 = vstv %s1502_s28  ;;  %s1568_s13 = sld [smem:[#allocation2 + $0x37]] }
  0x5d   :  { %v1536_v61 = vpop.eup %1060  ;;  %v405_v62 = vadd.f32 %v404_v58, %v401_v52  ;;  %v406_v4 = vadd.f32 %v404_v58, %v402_v53  ;;  %v409_v2 = vmul.f32 %v1240_v39, %v408_v60  ;;  %v410_v7 = vmul.f32 %v1245_v43, %v408_v60  ;;  %s1572_s14 = sld [smem:[#allocation2 + $0x41]] }
  0x5e   :  { %v1542_v8 = vpop.eup %1062  ;;  %v377_v3 = vadd.f32 %v375_v21, %v371_v56  ;;  %v378_v10 = vadd.f32 %v376_v22, %v372_v57  ;;  %v414_v6 = vstv %s1506_s29  ;;  %v420_v11 = vstv %s1510_s30  ;;  %s1577_s15 = sld [smem:[#allocation2 + $0x4b]] }
  0x5f   :  { %v411_v0 = vadd.f32 %v409_v2, %v405_v62  ;;  %v412_v12 = vadd.f32 %v410_v7, %v406_v4  ;;  %v415_v13 = vmul.f32 %v1252_v47, %v414_v6  ;;  %v416_v14 = vmul.f32 %v1258_v51, %v414_v6  ;;  %s1580_s16 = sld [smem:[#allocation2 + $0x55]] }
  0x60   :  { %v383_v16 = vadd.f32 %v381_v27, %v377_v3  ;;  %v384_v17 = vadd.f32 %v382_v29, %v378_v10  ;;  %v421_v18 = vmul.f32 %v1264_v55, %v420_v11  ;;  %v422_v20 = vmul.f32 %v1269_v59, %v420_v11  ;;  %s1586_s17 = sld [smem:[#allocation2 + $0x5f]] }
  0x61   :  { %v417_v21 = vadd.f32 %v415_v13, %v411_v0  ;;  %v418_v22 = vadd.f32 %v416_v14, %v412_v12  ;;  %v426_v24 = vstv %s1516_s3  ;;  %v432_v25 = vstv %s1522_s4  ;;  %s1590_s0 = sld [smem:[#allocation2 + $0x69]] }
  0x62   :  { %v389_v26 = vadd.f32 %v387_v44, %v383_v16  ;;  %v390_v30 = vadd.f32 %v388_v45, %v384_v17  ;;  %v427_v33 = vmul.f32 %v1276_v63, %v426_v24  ;;  %v428_v27 = vmul.f32 %v1282_v5, %v426_v24  ;;  %s1596_s20 = sld [smem:[#allocation2 + $0x73]] }
  0x63   :  { %v423_v29 = vadd.f32 %v421_v18, %v417_v21  ;;  %v424_v36 = vadd.f32 %v422_v20, %v418_v22  ;;  %v433_v37 = vmul.f32 %v1288_v9, %v432_v25  ;;  %v434_v38 = vmul.f32 %v1293_v1, %v432_v25  ;;  %s1600_s1 = sld [smem:[#allocation2 + $0x1a]] }
  0x64   :  { %v395_v52 = vadd.f32 %v393_v46, %v389_v26  ;;  %v396_v53 = vadd.f32 %v394_v49, %v390_v30  ;;  %v438_v56 = vstv %s1530_s5  ;;  %v444_v57 = vstv %s1534_s6  ;;  %s1606_s21 = sld [smem:[#allocation2 + $0x7e]] }
  0x65   :  { %v429_v44 = vadd.f32 %v427_v33, %v423_v29  ;;  %v430_v45 = vadd.f32 %v428_v27, %v424_v36  ;;  %v439_v58 = vmul.f32 %v1300_v15, %v438_v56  ;;  %v440_v60 = vmul.f32 %v1306_v19, %v438_v56  ;;  %s1612_s22 = sld [smem:[#allocation2 + $0x24]] }
  0x66   :  { %1064 = vtanh.f32 %v395_v52  ;;  %v445_v62 = vmul.f32 %v1312_v23, %v444_v57  ;;  %v446_v46 = vmul.f32 %v1319_v28, %v444_v57  ;;  %v450_v49 = vstv %s1540_s7  ;;  %s1616_s23 = sld [smem:[#allocation2 + $0x2e]] }
  0x67   :  { %1066 = vtanh.f32 %v396_v53  ;;  %v435_v4 = vadd.f32 %v433_v37, %v429_v44  ;;  %v436_v2 = vadd.f32 %v434_v38, %v430_v45  ;;  %v451_v7 = vmul.f32 %v1326_v34, %v450_v49  ;;  %s1620_s24 = sld [smem:[#allocation2 + $0x38]] }
  0x68   :  { %v452_v3 = vmul.f32 %v1333_v41, %v450_v49  ;;  %v456_v10 = vstv %s1546_s8  ;;  %v464_v6 = vstv %s1550_s9  ;;  %v468_v11 = vstv %s1554_s10  ;;  %s1628_s25 = sld [smem:[#allocation2 + $0x42]] }
  0x69   :  { %v441_v0 = vadd.f32 %v439_v58, %v435_v4  ;;  %v442_v12 = vadd.f32 %v440_v60, %v436_v2  ;;  %v457_v13 = vmul.f32 %v1340_v48, %v456_v10  ;;  %v458_v14 = vmul.f32 %v1347_v54, %v456_v10  ;;  %s1634_s26 = sld [smem:[#allocation2 + $0x4c]] }
  0x6a   :  { %v465_v16 = vmul.f32 %v1228_v31, %v464_v6  ;;  %v466_v17 = vmul.f32 %v1234_v35, %v464_v6  ;;  %v472_v18 = vstv %s1558_s11  ;;  %v478_v20 = vstv %s1562_s12  ;;  %s1642_s27 = sld [smem:[#allocation2 + $0x56]] }
  0x6b   :  { %v447_v21 = vadd.f32 %v445_v62, %v441_v0  ;;  %v448_v22 = vadd.f32 %v446_v46, %v442_v12  ;;  %v473_v24 = vmul.f32 %v1240_v39, %v472_v18  ;;  %v474_v25 = vmul.f32 %v1245_v43, %v472_v18  ;;  %s1646_s28 = sld [smem:[#allocation2 + $0x60]] }
  0x6c   :  { %v1602_v26 = vpop.eup %1064  ;;  %v469_v30 = vadd.f32 %v468_v11, %v465_v16  ;;  %v470_v33 = vadd.f32 %v468_v11, %v466_v17  ;;  %v479_v27 = vmul.f32 %v1252_v47, %v478_v20  ;;  %v480_v29 = vmul.f32 %v1258_v51, %v478_v20  ;;  %s1654_s29 = sld [smem:[#allocation2 + $0x6a]] }
  0x6d   :  { %v1608_v36 = vpop.eup %1066  ;;  %v453_v37 = vadd.f32 %v451_v7, %v447_v21  ;;  %v454_v38 = vadd.f32 %v452_v3, %v448_v22  ;;  %v484_v52 = vstv %s1568_s13  ;;  %v490_v53 = vstv %s1572_s14  ;;  %s1658_s30 = sld [smem:[#allocation2 + $0x74]] }
  0x6e   :  { %v475_v56 = vadd.f32 %v473_v24, %v469_v30  ;;  %v476_v57 = vadd.f32 %v474_v25, %v470_v33  ;;  %v485_v44 = vmul.f32 %v1264_v55, %v484_v52  ;;  %v486_v45 = vmul.f32 %v1269_v59, %v484_v52  ;;  %s1664_s3 = sld [smem:[#allocation2 + $0x1b]] }
  0x6f   :  { %v459_v58 = vadd.f32 %v457_v13, %v453_v37  ;;  %v460_v60 = vadd.f32 %v458_v14, %v454_v38  ;;  %v491_v62 = vmul.f32 %v1276_v63, %v490_v53  ;;  %v492_v46 = vmul.f32 %v1282_v5, %v490_v53  ;;  %s1668_s4 = sld [smem:[#allocation2 + $0x7f]] }
  0x70   :  { %v481_v49 = vadd.f32 %v479_v27, %v475_v56  ;;  %v482_v4 = vadd.f32 %v480_v29, %v476_v57  ;;  %v496_v2 = vstv %s1577_s15  ;;  %v502_v7 = vstv %s1580_s16  ;;  %s1672_s5 = sld [smem:[#allocation2 + $0x25]] }
  0x71   :  { %1068 = vtanh.f32 %v459_v58  ;;  %v497_v3 = vmul.f32 %v1288_v9, %v496_v2  ;;  %v498_v10 = vmul.f32 %v1293_v1, %v496_v2  ;;  %v503_v6 = vmul.f32 %v1300_v15, %v502_v7  ;;  %s1676_s6 = sld [smem:[#allocation2 + $0x2f]] }
  0x72   :  { %1070 = vtanh.f32 %v460_v60  ;;  %v487_v11 = vadd.f32 %v485_v44, %v481_v49  ;;  %v488_v0 = vadd.f32 %v486_v45, %v482_v4  ;;  %v504_v12 = vmul.f32 %v1306_v19, %v502_v7  ;;  %s1682_s7 = sld [smem:[#allocation2 + $0x39]] }
  0x73   :  { %v508_v13 = vstv %s1586_s17  ;;  %v514_v14 = vstv %s1590_s0  ;;  %v520_v16 = vstv %s1596_s20  ;;  %v528_v17 = vstv %s1600_s1  ;;  %s1686_s8 = sld [smem:[#allocation2 + $0x43]] }
  0x74   :  { %v493_v18 = vadd.f32 %v491_v62, %v487_v11  ;;  %v494_v20 = vadd.f32 %v492_v46, %v488_v0  ;;  %v509_v21 = vmul.f32 %v1312_v23, %v508_v13  ;;  %v510_v22 = vmul.f32 %v1319_v28, %v508_v13  ;;  %s1692_s9 = sld [smem:[#allocation2 + $0x4d]] }
  0x75   :  { %v515_v24 = vmul.f32 %v1326_v34, %v514_v14  ;;  %v516_v25 = vmul.f32 %v1333_v41, %v514_v14  ;;  %v521_v30 = vmul.f32 %v1340_v48, %v520_v16  ;;  %v522_v33 = vmul.f32 %v1347_v54, %v520_v16  ;;  %s1698_s10 = sld [smem:[#allocation2 + $0x57]] }
  0x76   :  { %v499_v27 = vadd.f32 %v497_v3, %v493_v18  ;;  %v500_v29 = vadd.f32 %v498_v10, %v494_v20  ;;  %v529_v37 = vmul.f32 %v1228_v31, %v528_v17  ;;  %v530_v38 = vmul.f32 %v1234_v35, %v528_v17  ;;  %s1702_s11 = sld [smem:[#allocation2 + $0x61]] }
  0x77   :  { %v1648_v52 = vpop.eup %1068  ;;  %v532_v53 = vstv %s1606_s21  ;;  %v536_v56 = vstv %s1612_s22  ;;  %v542_v57 = vstv %s1616_s23  ;;  %v548_v44 = vstv %s1620_s24  ;;  %s1708_s12 = sld [smem:[#allocation2 + $0x6b]] }
  0x78   :  { %v1656_v45 = vpop.eup %1070  ;;  %v505_v58 = vadd.f32 %v503_v6, %v499_v27  ;;  %v506_v60 = vadd.f32 %v504_v12, %v500_v29  ;;  %v533_v62 = vadd.f32 %v532_v53, %v529_v37  ;;  %v534_v46 = vadd.f32 %v532_v53, %v530_v38  ;;  %s1712_s13 = sld [smem:[#allocation2 + $0x75]] }
  0x79   :  { %v537_v49 = vmul.f32 %v1240_v39, %v536_v56  ;;  %v538_v4 = vmul.f32 %v1245_v43, %v536_v56  ;;  %v543_v2 = vmul.f32 %v1252_v47, %v542_v57  ;;  %v544_v7 = vmul.f32 %v1258_v51, %v542_v57  ;;  %s1722_s14 = sld [smem:[#allocation2 + $0x1c]] }
  0x7a   :  { %v511_v3 = vadd.f32 %v509_v21, %v505_v58  ;;  %v512_v10 = vadd.f32 %v510_v22, %v506_v60  ;;  %v549_v6 = vmul.f32 %v1264_v55, %v548_v44  ;;  %v550_v11 = vmul.f32 %v1269_v59, %v548_v44  ;;  %s1726_s15 = sld [smem:[#allocation2 + $0x80]] }
  0x7b   :  { %v539_v0 = vadd.f32 %v537_v49, %v533_v62  ;;  %v540_v12 = vadd.f32 %v538_v4, %v534_v46  ;;  %v554_v13 = vstv %s1628_s25  ;;  %v560_v14 = vstv %s1634_s26  ;;  %s1730_s16 = sld [smem:[#allocation2 + $0x26]] }
  0x7c   :  { %v517_v16 = vadd.f32 %v515_v24, %v511_v3  ;;  %v518_v17 = vadd.f32 %v516_v25, %v512_v10  ;;  %v555_v18 = vmul.f32 %v1276_v63, %v554_v13  ;;  %v556_v20 = vmul.f32 %v1282_v5, %v554_v13  ;;  %s1734_s17 = sld [smem:[#allocation2 + $0x30]] }
  0x7d   :  { %v545_v21 = vadd.f32 %v543_v2, %v539_v0  ;;  %v546_v22 = vadd.f32 %v544_v7, %v540_v12  ;;  %v561_v27 = vmul.f32 %v1288_v9, %v560_v14  ;;  %v562_v29 = vmul.f32 %v1293_v1, %v560_v14  ;;  %s1738_s0 = sld [smem:[#allocation2 + $0x3a]] }
  0x7e   :  { %v523_v37 = vadd.f32 %v521_v30, %v517_v16  ;;  %v524_v38 = vadd.f32 %v522_v33, %v518_v17  ;;  %v566_v53 = vstv %s1642_s27  ;;  %v572_v56 = vstv %s1646_s28  ;;  %s1745_s20 = sld [smem:[#allocation2 + $0x44]] }
  0x7f   :  { %v551_v24 = vadd.f32 %v549_v6, %v545_v21  ;;  %v552_v25 = vadd.f32 %v550_v11, %v546_v22  ;;  %v567_v57 = vmul.f32 %v1300_v15, %v566_v53  ;;  %v568_v44 = vmul.f32 %v1306_v19, %v566_v53  ;;  %s1748_s1 = sld [smem:[#allocation2 + $0x4e]] }
  0x80   :  { %1072 = vtanh.f32 %v523_v37  ;;  %v573_v58 = vmul.f32 %v1312_v23, %v572_v56  ;;  %v574_v30 = vmul.f32 %v1319_v28, %v572_v56  ;;  %v578_v33 = vstv %s1654_s29  ;;  %s1754_s21 = sld [smem:[#allocation2 + $0x58]] }
  0x81   :  { %1074 = vtanh.f32 %v524_v38  ;;  %v557_v60 = vadd.f32 %v555_v18, %v551_v24  ;;  %v558_v62 = vadd.f32 %v556_v20, %v552_v25  ;;  %v579_v46 = vmul.f32 %v1326_v34, %v578_v33  ;;  %s1758_s22 = sld [smem:[#allocation2 + $0x62]] }
  0x82   :  { %v580_v49 = vmul.f32 %v1333_v41, %v578_v33  ;;  %v584_v4 = vstv %s1658_s30  ;;  %v592_v2 = vstv %s1664_s3  ;;  %v596_v7 = vstv %s1668_s4  ;;  %s1764_s23 = sld [smem:[#allocation2 + $0x6c]] }
  0x83   :  { %v563_v3 = vadd.f32 %v561_v27, %v557_v60  ;;  %v564_v10 = vadd.f32 %v562_v29, %v558_v62  ;;  %v585_v6 = vmul.f32 %v1340_v48, %v584_v4  ;;  %v586_v11 = vmul.f32 %v1347_v54, %v584_v4  ;;  %s1768_s24 = sld [smem:[#allocation2 + $0x76]] }
  0x84   :  { %v593_v0 = vmul.f32 %v1228_v31, %v592_v2  ;;  %v594_v12 = vmul.f32 %v1234_v35, %v592_v2  ;;  %v600_v13 = vstv %s1672_s5  ;;  %v606_v14 = vstv %s1676_s6  ;;  %s1774_s25 = sld [smem:[#allocation2 + $0x1d]] }
  0x85   :  { %v569_v16 = vadd.f32 %v567_v57, %v563_v3  ;;  %v570_v17 = vadd.f32 %v568_v44, %v564_v10  ;;  %v601_v18 = vmul.f32 %v1240_v39, %v600_v13  ;;  %v602_v20 = vmul.f32 %v1245_v43, %v600_v13  ;;  %s1780_s26 = sld [smem:[#allocation2 + $0x81]] }
  0x86   :  { %v1714_v21 = vpop.eup %1072  ;;  %v597_v22 = vadd.f32 %v596_v7, %v593_v0  ;;  %v598_v27 = vadd.f32 %v596_v7, %v594_v12  ;;  %v607_v29 = vmul.f32 %v1252_v47, %v606_v14  ;;  %v608_v37 = vmul.f32 %v1258_v51, %v606_v14  ;;  %s1786_s27 = sld [smem:[#allocation2 + $0x27]] }
  0x87   :  { %v1718_v38 = vpop.eup %1074  ;;  %v575_v53 = vadd.f32 %v573_v58, %v569_v16  ;;  %v576_v56 = vadd.f32 %v574_v30, %v570_v17  ;;  %v612_v24 = vstv %s1682_s7  ;;  %v618_v25 = vstv %s1686_s8  ;;  %s1790_s28 = sld [smem:[#allocation2 + $0x31]] }
  0x88   :  { %v603_v57 = vadd.f32 %v601_v18, %v597_v22  ;;  %v604_v44 = vadd.f32 %v602_v20, %v598_v27  ;;  %v613_v33 = vmul.f32 %v1264_v55, %v612_v24  ;;  %v614_v60 = vmul.f32 %v1269_v59, %v612_v24  ;;  %s1796_s29 = sld [smem:[#allocation2 + $0x3b]] }
  0x89   :  { %v581_v62 = vadd.f32 %v579_v46, %v575_v53  ;;  %v582_v4 = vadd.f32 %v580_v49, %v576_v56  ;;  %v619_v2 = vmul.f32 %v1276_v63, %v618_v25  ;;  %v620_v58 = vmul.f32 %v1282_v5, %v618_v25  ;;  %s1801_s30 = sld [smem:[#allocation2 + $0x45]] }
  0x8a   :  { %v609_v30 = vadd.f32 %v607_v29, %v603_v57  ;;  %v610_v7 = vadd.f32 %v608_v37, %v604_v44  ;;  %v624_v3 = vstv %s1692_s9  ;;  %v630_v10 = vstv %s1698_s10  ;;  %s1808_s3 = sld [smem:[#allocation2 + $0x4f]] }
  0x8b   :  { %v587_v0 = vadd.f32 %v585_v6, %v581_v62  ;;  %v588_v12 = vadd.f32 %v586_v11, %v582_v4  ;;  %v625_v46 = vmul.f32 %v1288_v9, %v624_v3  ;;  %v626_v49 = vmul.f32 %v1293_v1, %v624_v3  ;;  %s1812_s4 = sld [smem:[#allocation2 + $0x59]] }
  0x8c   :  { %v615_v13 = vadd.f32 %v613_v33, %v609_v30  ;;  %v616_v14 = vadd.f32 %v614_v60, %v610_v7  ;;  %v631_v16 = vmul.f32 %v1300_v15, %v630_v10  ;;  %v632_v17 = vmul.f32 %v1306_v19, %v630_v10  ;;  %s1818_s5 = sld [smem:[#allocation2 + $0x63]] }
  0x8d   :  { %1076 = vtanh.f32 %v587_v0  ;;  %v636_v18 = vstv %s1702_s11  ;;  %v642_v20 = vstv %s1708_s12  ;;  %v648_v22 = vstv %s1712_s13  ;;  %s1822_s6 = sld [smem:[#allocation2 + $0x6d]] }
  0x8e   :  { %1078 = vtanh.f32 %v588_v12  ;;  %v621_v6 = vadd.f32 %v619_v2, %v615_v13  ;;  %v622_v11 = vadd.f32 %v620_v58, %v616_v14  ;;  %v637_v27 = vmul.f32 %v1312_v23, %v636_v18  ;;  %s1828_s7 = sld [smem:[#allocation2 + $0x77]] }
  0x8f   :  { %v638_v29 = vmul.f32 %v1319_v28, %v636_v18  ;;  %v643_v37 = vmul.f32 %v1326_v34, %v642_v20  ;;  %v644_v53 = vmul.f32 %v1333_v41, %v642_v20  ;;  %v649_v56 = vmul.f32 %v1340_v48, %v648_v22  ;;  %s1834_s8 = sld [smem:[#allocation2 + $0x82]] }
  0x90   :  { %v627_v24 = vadd.f32 %v625_v46, %v621_v6  ;;  %v628_v25 = vadd.f32 %v626_v49, %v622_v11  ;;  %v650_v57 = vmul.f32 %v1347_v54, %v648_v22  ;;  %v656_v44 = vstv %s1722_s14  ;;  %s1840_s9 = sld [smem:[#allocation2 + $0x8c]] }
  0x91   :  { %v657_v33 = vmul.f32 %v1228_v31, %v656_v44  ;;  %v658_v60 = vmul.f32 %v1234_v35, %v656_v44  ;;  %v660_v62 = vstv %s1726_s15  ;;  %v664_v4 = vstv %s1730_s16  ;;  %s1844_s10 = sld [smem:[#allocation2 + $0x83]] }
  0x92   :  { %v633_v2 = vadd.f32 %v631_v16, %v627_v24  ;;  %v634_v58 = vadd.f32 %v632_v17, %v628_v25  ;;  %v665_v30 = vmul.f32 %v1240_v39, %v664_v4  ;;  %v666_v7 = vmul.f32 %v1245_v43, %v664_v4  ;;  %s1848_s11 = sld [smem:[#allocation2 + $0x84]] }
  0x93   :  { %v1770_v3 = vpop.eup %1076  ;;  %v661_v10 = vadd.f32 %v660_v62, %v657_v33  ;;  %v662_v0 = vadd.f32 %v660_v62, %v658_v60  ;;  %v670_v12 = vstv %s1734_s17  ;;  %v676_v46 = vstv %s1738_s0  ;;  %s1852_s12 = sld [smem:[#allocation2 + $0x85]] }
  0x94   :  { %v1776_v49 = vpop.eup %1078  ;;  %v639_v13 = vadd.f32 %v637_v27, %v633_v2  ;;  %v640_v14 = vadd.f32 %v638_v29, %v634_v58  ;;  %v671_v16 = vmul.f32 %v1252_v47, %v670_v12  ;;  %v672_v17 = vmul.f32 %v1258_v51, %v670_v12  ;;  %s1858_s13 = sld [smem:[#allocation2 + $0x86]] }
  0x95   :  { %v667_v18 = vadd.f32 %v665_v30, %v661_v10  ;;  %v668_v20 = vadd.f32 %v666_v7, %v662_v0  ;;  %v677_v22 = vmul.f32 %v1264_v55, %v676_v46  ;;  %v678_v6 = vmul.f32 %v1269_v59, %v676_v46  ;;  %s1864_s14 = sld [smem:[#allocation2 + $0x87]] }
  0x96   :  { %v645_v11 = vadd.f32 %v643_v37, %v639_v13  ;;  %v646_v24 = vadd.f32 %v644_v53, %v640_v14  ;;  %v682_v25 = vstv %s1745_s20  ;;  %v688_v44 = vstv %s1748_s1  ;;  %s1872_s15 = sld [smem:[#allocation2 + $0x88]]  ;;  %s1162_s20 = smov [#allocation7]  }
  0x97   :  { %v673_v27 = vadd.f32 %v671_v16, %v667_v18  ;;  %v674_v29 = vadd.f32 %v672_v17, %v668_v20  ;;  %v683_v33 = vmul.f32 %v1276_v63, %v682_v25  ;;  %v684_v60 = vmul.f32 %v1282_v5, %v682_v25  ;;  %s1876_s16 = sld [smem:[#allocation2 + $0x89]]  ;;  %s851_s1 = sshll.u32 %s1162_s20, 4  ;;  %s852_s1 = int_to_ptr.vmem [resolvable:$true] %s851_s1 }
  0x98   :  { %v651_v62 = vadd.f32 %v649_v56, %v645_v11  ;;  %v652_v4 = vadd.f32 %v650_v57, %v646_v24  ;;  %v689_v2 = vmul.f32 %v1288_v9, %v688_v44  ;;  %v690_v37 = vmul.f32 %v1293_v1, %v688_v44  ;;  %s1882_s17 = sld [smem:[#allocation2 + $0x8a]] }
  0x99   :  { %v679_v53 = vadd.f32 %v677_v22, %v673_v27  ;;  %v680_v58 = vadd.f32 %v678_v6, %v674_v29  ;;  %v694_v30 = vstv %s1754_s21  ;;  %v700_v7 = vstv %s1758_s22  ;;  %s1888_s0 = sld [smem:[#allocation2 + $0x8b]] }
  0x9a   :  { %1080 = vtanh.f32 %v651_v62  ;;  %v695_v10 = vmul.f32 %v1300_v15, %v694_v30  ;;  %v696_v56 = vmul.f32 %v1306_v19, %v694_v30  ;;  %v701_v57 = vmul.f32 %v1312_v23, %v700_v7 }
  0x9b   :  { %1082 = vtanh.f32 %v652_v4  ;;  %v685_v0 = vadd.f32 %v683_v33, %v679_v53  ;;  %v686_v12 = vadd.f32 %v684_v60, %v680_v58  ;;  %v702_v46 = vmul.f32 %v1319_v28, %v700_v7 }
  0x9c   :  { %v706_v13 = vstv %s1764_s23  ;;  %v712_v14 = vstv %s1768_s24  ;;  %v720_v16 = vstv %s1774_s25  ;;  %v724_v17 = vstv %s1780_s26  ;;  %s853_s23 = sshll.u32 %s1912_s2, 4  ;;  %s854_s23 = int_to_ptr.hbm [resolvable:$true] %s853_s23 }
  0x9d   :  { %v691_v18 = vadd.f32 %v689_v2, %v685_v0  ;;  %v692_v20 = vadd.f32 %v690_v37, %v686_v12  ;;  %v707_v22 = vmul.f32 %v1326_v34, %v706_v13  ;;  %v708_v6 = vmul.f32 %v1333_v41, %v706_v13 }
  0x9e   :  { %v713_v11 = vmul.f32 %v1340_v48, %v712_v14  ;;  %v714_v24 = vmul.f32 %v1347_v54, %v712_v14  ;;  %v721_v25 = vmul.f32 %v1228_v31, %v720_v16  ;;  %v722_v44 = vmul.f32 %v1234_v35, %v720_v16 }
  0x9f   :  { %v697_v27 = vadd.f32 %v695_v10, %v691_v18  ;;  %v698_v29 = vadd.f32 %v696_v56, %v692_v20  ;;  %v728_v33 = vstv %s1786_s27  ;;  %v734_v60 = vstv %s1790_s28 }
  0xa0   :  { %v1824_v62 = vpop.eup %1080  ;;  %v725_v4 = vadd.f32 %v724_v17, %v721_v25  ;;  %v726_v2 = vadd.f32 %v724_v17, %v722_v44  ;;  %v729_v37 = vmul.f32 %v1240_v39, %v728_v33  ;;  %v730_v31 = vmul.f32 %v1245_v43, %v728_v33 }
  0xa1   :  { %v1830_v35 = vpop.eup %1082  ;;  %v703_v53 = vadd.f32 %v701_v57, %v697_v27  ;;  %v704_v58 = vadd.f32 %v702_v46, %v698_v29  ;;  %v735_v30 = vmul.f32 %v1252_v47, %v734_v60  ;;  %v736_v7 = vmul.f32 %v1258_v51, %v734_v60 }
  0xa2   :  { %v731_v10 = vadd.f32 %v729_v37, %v725_v4  ;;  %v732_v56 = vadd.f32 %v730_v31, %v726_v2  ;;  %v740_v0 = vstv %s1796_s29  ;;  %v746_v39 = vstv %s1801_s30 }
  0xa3   :  { %v709_v12 = vadd.f32 %v707_v22, %v703_v53  ;;  %v710_v43 = vadd.f32 %v708_v6, %v704_v58  ;;  %v741_v13 = vmul.f32 %v1264_v55, %v740_v0  ;;  %v742_v14 = vmul.f32 %v1269_v59, %v740_v0 }
  0xa4   :  { %v737_v57 = vadd.f32 %v735_v30, %v731_v10  ;;  %v738_v47 = vadd.f32 %v736_v7, %v732_v56  ;;  %v747_v51 = vmul.f32 %v1276_v63, %v746_v39  ;;  %v748_v46 = vmul.f32 %v1282_v5, %v746_v39 }
  0xa5   :  { %v715_v16 = vadd.f32 %v713_v11, %v709_v12  ;;  %v716_v17 = vadd.f32 %v714_v24, %v710_v43  ;;  %v752_v18 = vstv %s1808_s3  ;;  %v758_v20 = vstv %s1812_s4 }
  0xa6   :  { %v743_v55 = vadd.f32 %v741_v13, %v737_v57  ;;  %v744_v59 = vadd.f32 %v742_v14, %v738_v47  ;;  %v753_v22 = vmul.f32 %v1288_v9, %v752_v18  ;;  %v754_v63 = vmul.f32 %v1293_v1, %v752_v18 }
  0xa7   :  { %1084 = vtanh.f32 %v715_v16  ;;  %v759_v5 = vmul.f32 %v1300_v15, %v758_v20  ;;  %v760_v6 = vmul.f32 %v1306_v19, %v758_v20  ;;  %v764_v11 = vstv %s1818_s5 }
  0xa8   :  { %1086 = vtanh.f32 %v716_v17  ;;  %v749_v24 = vadd.f32 %v747_v51, %v743_v55  ;;  %v750_v25 = vadd.f32 %v748_v46, %v744_v59  ;;  %v765_v44 = vmul.f32 %v1312_v23, %v764_v11 }
  0xa9   :  { %v766_v27 = vmul.f32 %v1319_v28, %v764_v11  ;;  %v770_v9 = vstv %s1822_s6  ;;  %v776_v1 = vstv %s1828_s7  ;;  %v784_v29 = vstv %s1834_s8 }
  0xaa   :  { %v755_v15 = vadd.f32 %v753_v22, %v749_v24  ;;  %v756_v33 = vadd.f32 %v754_v63, %v750_v25  ;;  %v771_v19 = vmul.f32 %v1326_v34, %v770_v9  ;;  %v772_v60 = vmul.f32 %v1333_v41, %v770_v9 }
  0xab   :  { %v777_v4 = vmul.f32 %v1340_v48, %v776_v1  ;;  %v778_v23 = vmul.f32 %v1347_v54, %v776_v1  ;;  %v785_v2 = vmul.f32 %v1430_v32, %v784_v29  ;;  %v786_v28 = vmul.f32 %v1436_v40, %v784_v29 }
  0xac   :  { %v761_v37 = vadd.f32 %v759_v5, %v755_v15  ;;  %v762_v31 = vadd.f32 %v760_v6, %v756_v33  ;;  %v788_v53 = vstv %s1840_s9  ;;  %v792_v58 = vstv %s1844_s10 }
  0xad   :  { %v1085_v34 = vpop.eup %1084  ;;  %v789_v41 = vadd.f32 %v788_v53, %v785_v2  ;;  %v790_v30 = vadd.f32 %v788_v53, %v786_v28  ;;  %v793_v48 = vmul.f32 %v1480_v42, %v792_v58  ;;  %v794_v54 = vmul.f32 %v1488_v50, %v792_v58 }
  0xae   :  { %v1087_v32 = vpop.eup %1086  ;;  %v767_v7 = vadd.f32 %v765_v44, %v761_v37  ;;  %v768_v40 = vadd.f32 %v766_v27, %v762_v31  ;;  %v798_v10 = vstv %s1848_s11  ;;  %v804_v56 = vstv %s1852_s12 }
  0xaf   :  { %v795_v0 = vadd.f32 %v793_v48, %v789_v41  ;;  %v796_v39 = vadd.f32 %v794_v54, %v790_v30  ;;  %v799_v12 = vmul.f32 %v1536_v61, %v798_v10  ;;  %v800_v43 = vmul.f32 %v1542_v8, %v798_v10 }
  0xb0   :  { %v773_v13 = vadd.f32 %v771_v19, %v767_v7  ;;  %v774_v14 = vadd.f32 %v772_v60, %v768_v40  ;;  %v805_v42 = vmul.f32 %v1602_v26, %v804_v56  ;;  %v806_v50 = vmul.f32 %v1608_v36, %v804_v56 }
  0xb1   :  { %v801_v57 = vadd.f32 %v799_v12, %v795_v0  ;;  %v802_v47 = vadd.f32 %v800_v43, %v796_v39  ;;  %v810_v51 = vstv %s1858_s13  ;;  %v816_v46 = vstv %s1864_s14 }
  0xb2   :  { %v779_v16 = vadd.f32 %v777_v4, %v773_v13  ;;  %v780_v17 = vadd.f32 %v778_v23, %v774_v14  ;;  %v811_v61 = vmul.f32 %v1648_v52, %v810_v51  ;;  %v812_v8 = vmul.f32 %v1656_v45, %v810_v51 }
  0xb3   :  { %v807_v18 = vadd.f32 %v805_v42, %v801_v57  ;;  %v808_v20 = vadd.f32 %v806_v50, %v802_v47  ;;  %v817_v26 = vmul.f32 %v1714_v21, %v816_v46  ;;  %v818_v36 = vmul.f32 %v1718_v38, %v816_v46 }
  0xb4   :  { %1088 = vtanh.f32 %v779_v16  ;;  %v822_v55 = vstv %s1872_s15  ;;  %v828_v59 = vstv %s1876_s16  ;;  %v834_v52 = vstv %s1882_s17 }
  0xb5   :  { %1090 = vtanh.f32 %v780_v17  ;;  %v813_v22 = vadd.f32 %v811_v61, %v807_v18  ;;  %v814_v63 = vadd.f32 %v812_v8, %v808_v20  ;;  %v823_v5 = vmul.f32 %v1770_v3, %v822_v55 }
  0xb6   :  { %v824_v6 = vmul.f32 %v1776_v49, %v822_v55  ;;  %v829_v24 = vmul.f32 %v1824_v62, %v828_v59  ;;  %v830_v25 = vmul.f32 %v1830_v35, %v828_v59  ;;  %v840_v21 = vstv %s1888_s0 }
  0xb7   :  { %v819_v11 = vadd.f32 %v817_v26, %v813_v22  ;;  %v820_v45 = vadd.f32 %v818_v36, %v814_v63  ;;  %v835_v27 = vmul.f32 %v1085_v34, %v834_v52  ;;  %v836_v9 = vmul.f32 %v1087_v32, %v834_v52 }
  0xb9   :  { %v825_v44 = vadd.f32 %v823_v5, %v819_v11  ;;  %v826_v38 = vadd.f32 %v824_v6, %v820_v45 }
  0xba   :  { %v1089_v1 = vpop.eup %1088 }
  0xbb   :  { %v1091_v29 = vpop.eup %1090  ;;  %v831_v15 = vadd.f32 %v829_v24, %v825_v44  ;;  %v832_v33 = vadd.f32 %v830_v25, %v826_v38  ;;  %v841_v19 = vmul.f32 %v1089_v1, %v840_v21 }
  0xbc   :  { %v842_v3 = vmul.f32 %v1091_v29, %v840_v21 }
  0xbd   :  { %v837_v60 = vadd.f32 %v835_v27, %v831_v15  ;;  %v838_v49 = vadd.f32 %v836_v9, %v832_v33 }
  0xbf   :  { %v843_v62 = vadd.f32 %v841_v19, %v837_v60  ;;  %v844_v35 = vadd.f32 %v842_v3, %v838_v49 }
  0xc1   :  { %845 = vst [vmem:[#allocation7] sm:$0xff] %v843_v62 }
  0xc2   :  { %846 = vst [vmem:[#allocation7 + $0x8] sm:$0xff] %v844_v35 }
  0xc3   :  { %859 = dma.vmem_to_hbm [thread:$0]  %s852_s1, 256, %s854_s23, [#allocation4], %s1160_s18, %s1160_s18, %s1161_s19  }
  0xc4   :  { %1156 = dma.done.wait [#allocation4], 256  }
  0xc5   :  { %1157 = vsyncadd [#allocation4], 4294967040 }
  0xc6   :  { %864 = vsyncpa [#allocation3], 1 }
  0xc7   :  { %865 = vsyncpa [#allocation4], 1 }
  0xc8   :  { %866 = vsyncpa [#allocation5], 1 }

</bundles_post_ra>
